<compile_context>
chip_gen: v7x
topology: tpu7x:2x2x1
jax: 0.10.0
libtpu: 0.0.40
codegen_flags: <defaults>
</compile_context>

<pallas_src>
import jax
import jax.numpy as jnp
from jax import lax
from jax.experimental import pallas as pl
from jax.experimental.pallas import tpu as pltpu

# ---- model config (mirrors the PyTorch module constants) ----
EMBED = 64        # embedding_dim
HEADS = 4         # num_heads
HIDDEN = 128      # hidden_dim
HEAD_DIM = EMBED // HEADS
EPS = 1e-5        # nn.LayerNorm default eps

# ---- small example shapes ----
SEQ = 8
BATCH = 2


def _layer_norm(v, g, b):
    mu = jnp.mean(v, axis=-1, keepdims=True)
    c = v - mu
    var = jnp.mean(c * c, axis=-1, keepdims=True)
    return c * lax.rsqrt(var + EPS) * g + b


def _encoder_layer_kernel(x_ref,
                          wq_ref, bq_ref, wk_ref, bk_ref, wv_ref, bv_ref,
                          wo_ref, bo_ref,
                          ln1_g_ref, ln1_b_ref,
                          w2_ref, b2_ref,
                          w1a_ref, b1a_ref, w1b_ref, b1b_ref,
                          lng_g_ref, lng_b_ref,
                          ln2_g_ref, ln2_b_ref,
                          out_ref):
    # One batch element per grid step: x is (S, E).
    x = x_ref[...]
    S, E = x.shape

    # ---- multi-head self-attention (scale pre-folded into wq/bq) ----
    q = jnp.dot(x, wq_ref[...], preferred_element_type=jnp.float32) + bq_ref[...]
    k = jnp.dot(x, wk_ref[...], preferred_element_type=jnp.float32) + bk_ref[...]
    v = jnp.dot(x, wv_ref[...], preferred_element_type=jnp.float32) + bv_ref[...]

    # (S, E) -> (H, S, Dh); heads become the batch axis of two batched dots.
    qh = jnp.swapaxes(q.reshape(S, HEADS, HEAD_DIM), 0, 1)
    kh = jnp.swapaxes(k.reshape(S, HEADS, HEAD_DIM), 0, 1)
    vh = jnp.swapaxes(v.reshape(S, HEADS, HEAD_DIM), 0, 1)

    s = jnp.einsum('hqd,hkd->hqk', qh, kh, preferred_element_type=jnp.float32)
    s = s - jnp.max(s, axis=-1, keepdims=True)
    p = jnp.exp(s)
    p = p * pl.reciprocal(jnp.sum(p, axis=-1, keepdims=True), approx=True)
    ctx = jnp.einsum('hqk,hkd->hqd', p, vh, preferred_element_type=jnp.float32)
    attn = jnp.swapaxes(ctx, 0, 1).reshape(S, E)
    attn = jnp.dot(attn, wo_ref[...], preferred_element_type=jnp.float32) + bo_ref[...]

    # ---- residual + LayerNorm 1 ----
    x1 = _layer_norm(x + attn, ln1_g_ref[...], ln1_b_ref[...])

    # ---- GRN (biases pre-summed in the wrapper) ----
    g2 = jnp.dot(x1, w2_ref[...], preferred_element_type=jnp.float32) + b2_ref[...]
    # ELU (alpha=1); clamp the exp argument so the unselected branch never infs.
    g2 = jnp.where(g2 > 0, g2, jnp.exp(jnp.minimum(g2, 0.0)) - 1.0)
    a_half = jnp.dot(g2, w1a_ref[...], preferred_element_type=jnp.float32) + b1a_ref[...]
    b_half = jnp.dot(g2, w1b_ref[...], preferred_element_type=jnp.float32) + b1b_ref[...]
    gate = pl.reciprocal(1.0 + jnp.exp(-b_half), approx=True)   # sigmoid via EUP
    glu = a_half * gate
    grn = _layer_norm(x1 + glu, lng_g_ref[...], lng_b_ref[...])

    # ---- residual + LayerNorm 2 ----
    out_ref[...] = _layer_norm(x1 + grn, ln2_g_ref[...], ln2_b_ref[...])


def encoder_layer_pallas(x_sbe, params):
    """x_sbe: (SEQ, BATCH, EMBED) float32 (PyTorch MHA layout)."""
    S, B, E = x_sbe.shape
    x_bse = jnp.transpose(x_sbe, (1, 0, 2))

    # ---- parameter prep: fold scale / split packed projections / sum biases ----
    scale = 1.0 / (HEAD_DIM ** 0.5)
    wq = params['in_proj_w'][:E].T * scale
    bq = params['in_proj_b'][:E] * scale
    wk = params['in_proj_w'][E:2 * E].T
    bk = params['in_proj_b'][E:2 * E]
    wv = params['in_proj_w'][2 * E:].T
    bv = params['in_proj_b'][2 * E:]
    wo = params['out_proj_w'].T
    bo = params['out_proj_b']

    w2 = params['grn_w2'].T                              # (E, HIDDEN)
    b2 = params['grn_w2_b'] + params['grn_b2']           # fold duplicate biases
    w1 = params['grn_w1'].T                              # (HIDDEN, 2E)
    b1 = params['grn_w1_b'] + params['grn_b1']
    w1a, w1b = w1[:, :E], w1[:, E:]                      # GLU halves split outside
    b1a, b1b = b1[:E], b1[E:]

    inputs = [
        x_bse,
        wq, bq[None, :], wk, bk[None, :], wv, bv[None, :],
        wo, bo[None, :],
        params['ln1_g'][None, :], params['ln1_b'][None, :],
        w2, b2[None, :],
        w1a, b1a[None, :], w1b, b1b[None, :],
        params['grn_ln_g'][None, :], params['grn_ln_b'][None, :],
        params['ln2_g'][None, :], params['ln2_b'][None, :],
    ]

    # x / out: one batch element per grid step (leading dim squeezed away).
    x_spec = pl.BlockSpec((None, S, E), lambda b: (b, 0, 0))
    # Weights/biases: constant block index -> stay resident in VMEM across steps.
    w_specs = [pl.BlockSpec(a.shape, (lambda b, n=a.ndim: (0,) * n))
               for a in inputs[1:]]

    out = pl.pallas_call(
        _encoder_layer_kernel,
        out_shape=jax.ShapeDtypeStruct((B, S, E), jnp.float32),
        grid=(B,),
        in_specs=[x_spec] + w_specs,
        out_specs=pl.BlockSpec((None, S, E), lambda b: (b, 0, 0)),
        compiler_params=pltpu.CompilerParams(
            dimension_semantics=("parallel",),
            vmem_limit_bytes=16 * 1024 * 1024,
        ),
    )(*inputs)
    return jnp.transpose(out, (1, 0, 2))


def init_params(key):
    """Deterministic synthetic parameters with the shapes implied by __init__."""
    ks = jax.random.split(key, 8)
    E, H2, HID = EMBED, 2 * EMBED, HIDDEN

    def lin_w(k, out_d, in_d):
        bound = 1.0 / (in_d ** 0.5)
        return jax.random.uniform(k, (out_d, in_d), jnp.float32, -bound, bound)

    def lin_b(k, out_d, in_d):
        bound = 1.0 / (in_d ** 0.5)
        return jax.random.uniform(k, (out_d,), jnp.float32, -bound, bound)

    return dict(
        # nn.MultiheadAttention packed in-projection + out-projection
        in_proj_w=jax.random.normal(ks[0], (3 * E, E), jnp.float32) * (E ** -0.5),
        in_proj_b=jnp.zeros((3 * E,), jnp.float32),
        out_proj_w=lin_w(ks[1], E, E),
        out_proj_b=jnp.zeros((E,), jnp.float32),
        ln1_g=jnp.ones((E,), jnp.float32),
        ln1_b=jnp.zeros((E,), jnp.float32),
        # GRN
        grn_w2=lin_w(ks[2], HID, E),
        grn_w2_b=lin_b(ks[3], HID, E),
        grn_b2=jnp.zeros((HID,), jnp.float32),   # nn.Parameter(torch.zeros(hidden_dim))
        # TODO(synk): the reference GRN declares W1: Linear(hidden_dim, input_dim) and
        # b1=zeros(input_dim), but `z + F.glu(g1, dim=-1)` is then a 64-vs-32 shape
        # mismatch that raises in PyTorch; we size W1 as hidden_dim -> 2*input_dim
        # (standard TFT GRN) so the GLU output matches the residual / LayerNorm(input_dim).
        grn_w1=lin_w(ks[4], H2, HID),
        grn_w1_b=lin_b(ks[5], H2, HID),
        grn_b1=jnp.zeros((H2,), jnp.float32),
        grn_ln_g=jnp.ones((E,), jnp.float32),
        grn_ln_b=jnp.zeros((E,), jnp.float32),
        ln2_g=jnp.ones((E,), jnp.float32),
        ln2_b=jnp.zeros((E,), jnp.float32),
    )


def encoder_layer_ref(x_sbe, p):
    """Pure-JAX reference mirroring PyTorch semantics (S, B, E layout)."""
    S, B, E = x_sbe.shape
    xf = x_sbe.reshape(S * B, E)
    qkv = xf @ p['in_proj_w'].T + p['in_proj_b']
    q, k, v = qkv[:, :E], qkv[:, E:2 * E], qkv[:, 2 * E:]

    def split_heads(t):
        return t.reshape(S, B * HEADS, HEAD_DIM).transpose(1, 0, 2)   # (B*H, S, Dh)

    qh, kh, vh = split_heads(q), split_heads(k), split_heads(v)
    scale = 1.0 / (HEAD_DIM ** 0.5)
    sc = jnp.einsum('nsd,ntd->nst', qh * scale, kh)
    pw = jax.nn.softmax(sc, axis=-1)
    o = jnp.einsum('nst,ntd->nsd', pw, vh).transpose(1, 0, 2).reshape(S * B, E)
    attn = o @ p['out_proj_w'].T + p['out_proj_b']

    def ln(v_, g, b):
        mu = v_.mean(-1, keepdims=True)
        c = v_ - mu
        var = (c * c).mean(-1, keepdims=True)
        return c / jnp.sqrt(var + EPS) * g + b

    x1 = ln(xf + attn, p['ln1_g'], p['ln1_b'])
    g2 = jax.nn.elu(x1 @ p['grn_w2'].T + p['grn_w2_b'] + p['grn_b2'])
    g1 = g2 @ p['grn_w1'].T + p['grn_w1_b'] + p['grn_b1']
    glu = g1[:, :E] * jax.nn.sigmoid(g1[:, E:])
    grn = ln(x1 + glu, p['grn_ln_g'], p['grn_ln_b'])
    x2 = ln(x1 + grn, p['ln2_g'], p['ln2_b'])
    return x2.reshape(S, B, E)


if __name__ == "__main__":
    key = jax.random.PRNGKey(0)
    pk, xk = jax.random.split(key)
    params = init_params(pk)
    x = jax.random.normal(xk, (SEQ, BATCH, EMBED), jnp.float32)

    out = encoder_layer_pallas(x, params)
    out = jax.block_until_ready(out)
    assert out.shape == (SEQ, BATCH, EMBED)

    ref = encoder_layer_ref(x, params)
    max_err = float(jnp.max(jnp.abs(out - ref)))
    # Slightly relaxed tolerance: softmax denom / GLU sigmoid use the EUP's
    # approximate reciprocal (rel err ~2^-12); matmuls remain f32.
    assert max_err < 2e-3, f"kernel/reference mismatch: max abs err {max_err}"
    print("KERNEL_OK")
</pallas_src>

<mosaic_0001>
module attributes {stable_mosaic.version = 11 : i64} {
  func.func @_encoder_layer_kernel(%arg0: i32, %arg1: memref<1x8x64xf32, #tpu.memory_space<vmem>>, %arg2: memref<64x64xf32, #tpu.memory_space<vmem>>, %arg3: memref<1x64xf32, #tpu.memory_space<vmem>>, %arg4: memref<64x64xf32, #tpu.memory_space<vmem>>, %arg5: memref<1x64xf32, #tpu.memory_space<vmem>>, %arg6: memref<64x64xf32, #tpu.memory_space<vmem>>, %arg7: memref<1x64xf32, #tpu.memory_space<vmem>>, %arg8: memref<64x64xf32, #tpu.memory_space<vmem>>, %arg9: memref<1x64xf32, #tpu.memory_space<vmem>>, %arg10: memref<1x64xf32, #tpu.memory_space<vmem>>, %arg11: memref<1x64xf32, #tpu.memory_space<vmem>>, %arg12: memref<64x128xf32, #tpu.memory_space<vmem>>, %arg13: memref<1x128xf32, #tpu.memory_space<vmem>>, %arg14: memref<128x64xf32, #tpu.memory_space<vmem>>, %arg15: memref<1x64xf32, #tpu.memory_space<vmem>>, %arg16: memref<128x64xf32, #tpu.memory_space<vmem>>, %arg17: memref<1x64xf32, #tpu.memory_space<vmem>>, %arg18: memref<1x64xf32, #tpu.memory_space<vmem>>, %arg19: memref<1x64xf32, #tpu.memory_space<vmem>>, %arg20: memref<1x64xf32, #tpu.memory_space<vmem>>, %arg21: memref<1x64xf32, #tpu.memory_space<vmem>>, %arg22: memref<1x8x64xf32, #tpu.memory_space<vmem>>) attributes {dimension_semantics = [#tpu.dimension_semantics<parallel>], iteration_bounds = array<i64: 2>, scalar_prefetch = 0 : i64, scratch_operands = 0 : i64, tpu.core_type = #tpu.core_type<tc>, window_params = [{transform_indices = @transform_0, window_bounds = array<i64: 1, 8, 64>}, {pipeline_mode = #tpu.pipeline_mode<synchronous>, transform_indices = @transform_1, window_bounds = array<i64: 64, 64>}, {pipeline_mode = #tpu.pipeline_mode<synchronous>, transform_indices = @transform_2, window_bounds = array<i64: 1, 64>}, {pipeline_mode = #tpu.pipeline_mode<synchronous>, transform_indices = @transform_3, window_bounds = array<i64: 64, 64>}, {pipeline_mode = #tpu.pipeline_mode<synchronous>, transform_indices = @transform_4, window_bounds = array<i64: 1, 64>}, {pipeline_mode = #tpu.pipeline_mode<synchronous>, transform_indices = @transform_5, window_bounds = array<i64: 64, 64>}, {pipeline_mode = #tpu.pipeline_mode<synchronous>, transform_indices = @transform_6, window_bounds = array<i64: 1, 64>}, {pipeline_mode = #tpu.pipeline_mode<synchronous>, transform_indices = @transform_7, window_bounds = array<i64: 64, 64>}, {pipeline_mode = #tpu.pipeline_mode<synchronous>, transform_indices = @transform_8, window_bounds = array<i64: 1, 64>}, {pipeline_mode = #tpu.pipeline_mode<synchronous>, transform_indices = @transform_9, window_bounds = array<i64: 1, 64>}, {pipeline_mode = #tpu.pipeline_mode<synchronous>, transform_indices = @transform_10, window_bounds = array<i64: 1, 64>}, {pipeline_mode = #tpu.pipeline_mode<synchronous>, transform_indices = @transform_11, window_bounds = array<i64: 64, 128>}, {pipeline_mode = #tpu.pipeline_mode<synchronous>, transform_indices = @transform_12, window_bounds = array<i64: 1, 128>}, {pipeline_mode = #tpu.pipeline_mode<synchronous>, transform_indices = @transform_13, window_bounds = array<i64: 128, 64>}, {pipeline_mode = #tpu.pipeline_mode<synchronous>, transform_indices = @transform_14, window_bounds = array<i64: 1, 64>}, {pipeline_mode = #tpu.pipeline_mode<synchronous>, transform_indices = @transform_15, window_bounds = array<i64: 128, 64>}, {pipeline_mode = #tpu.pipeline_mode<synchronous>, transform_indices = @transform_16, window_bounds = array<i64: 1, 64>}, {pipeline_mode = #tpu.pipeline_mode<synchronous>, transform_indices = @transform_17, window_bounds = array<i64: 1, 64>}, {pipeline_mode = #tpu.pipeline_mode<synchronous>, transform_indices = @transform_18, window_bounds = array<i64: 1, 64>}, {pipeline_mode = #tpu.pipeline_mode<synchronous>, transform_indices = @transform_19, window_bounds = array<i64: 1, 64>}, {pipeline_mode = #tpu.pipeline_mode<synchronous>, transform_indices = @transform_20, window_bounds = array<i64: 1, 64>}, {transform_indices = @transform_21, window_bounds = array<i64: 1, 8, 64>}]} {
    %c0 = arith.constant 0 : index
    %c0_0 = arith.constant 0 : index
    %c0_1 = arith.constant 0 : index
    %0 = vector.load %arg1[%c0, %c0_0, %c0_1] : memref<1x8x64xf32, #tpu.memory_space<vmem>>, vector<1x8x64xf32>
    %1 = vector.shape_cast %0 : vector<1x8x64xf32> to vector<8x64xf32>
    %c0_2 = arith.constant 0 : index
    %c0_3 = arith.constant 0 : index
    %2 = vector.load %arg2[%c0_2, %c0_3] : memref<64x64xf32, #tpu.memory_space<vmem>>, vector<64x64xf32>
    %cst = arith.constant dense<0.000000e+00> : vector<8x64xf32>
    %3 = tpu.matmul %1, %2, %cst {dimension_numbers = #tpu.dot_dimension_numbers<[1], [0], [0], [1], [0, 0, 1, 1], [], []>} : vector<8x64xf32>, vector<64x64xf32>, vector<8x64xf32> -> vector<8x64xf32>
    %c0_4 = arith.constant 0 : index
    %c0_5 = arith.constant 0 : index
    %4 = vector.load %arg3[%c0_4, %c0_5] : memref<1x64xf32, #tpu.memory_space<vmem>>, vector<1x64xf32>
    %5 = vector.broadcast %4 : vector<1x64xf32> to vector<8x64xf32>
    %6 = arith.addf %3, %5 : vector<8x64xf32>
    %c0_6 = arith.constant 0 : index
    %c0_7 = arith.constant 0 : index
    %7 = vector.load %arg4[%c0_6, %c0_7] : memref<64x64xf32, #tpu.memory_space<vmem>>, vector<64x64xf32>
    %cst_8 = arith.constant dense<0.000000e+00> : vector<8x64xf32>
    %8 = tpu.matmul %1, %7, %cst_8 {dimension_numbers = #tpu.dot_dimension_numbers<[1], [0], [0], [1], [0, 0, 1, 1], [], []>} : vector<8x64xf32>, vector<64x64xf32>, vector<8x64xf32> -> vector<8x64xf32>
    %c0_9 = arith.constant 0 : index
    %c0_10 = arith.constant 0 : index
    %9 = vector.load %arg5[%c0_9, %c0_10] : memref<1x64xf32, #tpu.memory_space<vmem>>, vector<1x64xf32>
    %10 = vector.broadcast %9 : vector<1x64xf32> to vector<8x64xf32>
    %11 = arith.addf %8, %10 : vector<8x64xf32>
    %c0_11 = arith.constant 0 : index
    %c0_12 = arith.constant 0 : index
    %12 = vector.load %arg6[%c0_11, %c0_12] : memref<64x64xf32, #tpu.memory_space<vmem>>, vector<64x64xf32>
    %cst_13 = arith.constant dense<0.000000e+00> : vector<8x64xf32>
    %13 = tpu.matmul %1, %12, %cst_13 {dimension_numbers = #tpu.dot_dimension_numbers<[1], [0], [0], [1], [0, 0, 1, 1], [], []>} : vector<8x64xf32>, vector<64x64xf32>, vector<8x64xf32> -> vector<8x64xf32>
    %c0_14 = arith.constant 0 : index
    %c0_15 = arith.constant 0 : index
    %14 = vector.load %arg7[%c0_14, %c0_15] : memref<1x64xf32, #tpu.memory_space<vmem>>, vector<1x64xf32>
    %15 = vector.broadcast %14 : vector<1x64xf32> to vector<8x64xf32>
    %16 = arith.addf %13, %15 : vector<8x64xf32>
    %17 = vector.shape_cast %6 : vector<8x64xf32> to vector<8x4x16xf32>
    %18 = tpu.transpose %17, [1, 0, 2] : vector<8x4x16xf32> -> vector<4x8x16xf32>
    %19 = vector.shape_cast %11 : vector<8x64xf32> to vector<8x4x16xf32>
    %20 = tpu.transpose %19, [1, 0, 2] : vector<8x4x16xf32> -> vector<4x8x16xf32>
    %21 = vector.shape_cast %16 : vector<8x64xf32> to vector<8x4x16xf32>
    %22 = tpu.transpose %21, [1, 0, 2] : vector<8x4x16xf32> -> vector<4x8x16xf32>
    "tpu.trace_start"() <{level = 10 : i32, message = "hqd,hkd->hqk"}> : () -> ()
    %cst_16 = arith.constant dense<0.000000e+00> : vector<4x8x8xf32>
    %23 = tpu.matmul %18, %20, %cst_16 {dimension_numbers = #tpu.dot_dimension_numbers<[2], [2], [1], [1], [0, 0, 0, 1, 1, 1], [0], [0]>} : vector<4x8x16xf32>, vector<4x8x16xf32>, vector<4x8x8xf32> -> vector<4x8x8xf32>
    "tpu.trace_stop"() : () -> ()
    %cst_17 = arith.constant dense<0xFF800000> : vector<4x8xf32>
    %24 = vector.multi_reduction <maximumf>, %23, %cst_17 [2] : vector<4x8x8xf32> to vector<4x8xf32>
    %25 = vector.shape_cast %24 : vector<4x8xf32> to vector<4x8x1xf32>
    %26 = vector.broadcast %25 : vector<4x8x1xf32> to vector<4x8x8xf32>
    %27 = arith.subf %23, %26 : vector<4x8x8xf32>
    %28 = math.exp %27 : vector<4x8x8xf32>
    %cst_18 = arith.constant dense<0.000000e+00> : vector<4x8xf32>
    %29 = vector.multi_reduction <add>, %28, %cst_18 [2] : vector<4x8x8xf32> to vector<4x8xf32>
    %30 = vector.shape_cast %29 : vector<4x8xf32> to vector<4x8x1xf32>
    %31 = tpu.reciprocal %30 {approx = true} : vector<4x8x1xf32> -> vector<4x8x1xf32>
    %32 = vector.broadcast %31 : vector<4x8x1xf32> to vector<4x8x8xf32>
    %33 = arith.mulf %28, %32 : vector<4x8x8xf32>
    "tpu.trace_start"() <{level = 10 : i32, message = "hqk,hkd->hqd"}> : () -> ()
    %cst_19 = arith.constant dense<0.000000e+00> : vector<4x8x16xf32>
    %34 = tpu.matmul %33, %22, %cst_19 {dimension_numbers = #tpu.dot_dimension_numbers<[2], [1], [1], [2], [0, 0, 0, 1, 1, 2], [0], [0]>} : vector<4x8x8xf32>, vector<4x8x16xf32>, vector<4x8x16xf32> -> vector<4x8x16xf32>
    "tpu.trace_stop"() : () -> ()
    %35 = tpu.transpose %34, [1, 0, 2] : vector<4x8x16xf32> -> vector<8x4x16xf32>
    %36 = vector.shape_cast %35 : vector<8x4x16xf32> to vector<8x64xf32>
    %c0_20 = arith.constant 0 : index
    %c0_21 = arith.constant 0 : index
    %37 = vector.load %arg8[%c0_20, %c0_21] : memref<64x64xf32, #tpu.memory_space<vmem>>, vector<64x64xf32>
    %cst_22 = arith.constant dense<0.000000e+00> : vector<8x64xf32>
    %38 = tpu.matmul %36, %37, %cst_22 {dimension_numbers = #tpu.dot_dimension_numbers<[1], [0], [0], [1], [0, 0, 1, 1], [], []>} : vector<8x64xf32>, vector<64x64xf32>, vector<8x64xf32> -> vector<8x64xf32>
    %c0_23 = arith.constant 0 : index
    %c0_24 = arith.constant 0 : index
    %39 = vector.load %arg9[%c0_23, %c0_24] : memref<1x64xf32, #tpu.memory_space<vmem>>, vector<1x64xf32>
    %40 = vector.broadcast %39 : vector<1x64xf32> to vector<8x64xf32>
    %41 = arith.addf %38, %40 : vector<8x64xf32>
    %42 = arith.addf %1, %41 : vector<8x64xf32>
    %c0_25 = arith.constant 0 : index
    %c0_26 = arith.constant 0 : index
    %43 = vector.load %arg10[%c0_25, %c0_26] : memref<1x64xf32, #tpu.memory_space<vmem>>, vector<1x64xf32>
    %c0_27 = arith.constant 0 : index
    %c0_28 = arith.constant 0 : index
    %44 = vector.load %arg11[%c0_27, %c0_28] : memref<1x64xf32, #tpu.memory_space<vmem>>, vector<1x64xf32>
    %cst_29 = arith.constant dense<0.000000e+00> : vector<8xf32>
    %45 = vector.multi_reduction <add>, %42, %cst_29 [1] : vector<8x64xf32> to vector<8xf32>
    %46 = vector.shape_cast %45 : vector<8xf32> to vector<8x1xf32>
    %cst_30 = arith.constant 6.400000e+01 : f32
    %47 = vector.broadcast %cst_30 : f32 to vector<8x1xf32>
    %48 = arith.divf %46, %47 : vector<8x1xf32>
    %49 = vector.broadcast %48 : vector<8x1xf32> to vector<8x64xf32>
    %50 = arith.subf %42, %49 : vector<8x64xf32>
    %51 = arith.mulf %50, %50 : vector<8x64xf32>
    %cst_31 = arith.constant dense<0.000000e+00> : vector<8xf32>
    %52 = vector.multi_reduction <add>, %51, %cst_31 [1] : vector<8x64xf32> to vector<8xf32>
    %53 = vector.shape_cast %52 : vector<8xf32> to vector<8x1xf32>
    %cst_32 = arith.constant 6.400000e+01 : f32
    %54 = vector.broadcast %cst_32 : f32 to vector<8x1xf32>
    %55 = arith.divf %53, %54 : vector<8x1xf32>
    %cst_33 = arith.constant 9.99999974E-6 : f32
    %56 = vector.broadcast %cst_33 : f32 to vector<8x1xf32>
    %57 = arith.addf %55, %56 : vector<8x1xf32>
    %58 = math.rsqrt %57 : vector<8x1xf32>
    %59 = vector.broadcast %58 : vector<8x1xf32> to vector<8x64xf32>
    %60 = arith.mulf %50, %59 : vector<8x64xf32>
    %61 = vector.broadcast %43 : vector<1x64xf32> to vector<8x64xf32>
    %62 = arith.mulf %60, %61 : vector<8x64xf32>
    %63 = vector.broadcast %44 : vector<1x64xf32> to vector<8x64xf32>
    %64 = arith.addf %62, %63 : vector<8x64xf32>
    %c0_34 = arith.constant 0 : index
    %c0_35 = arith.constant 0 : index
    %65 = vector.load %arg12[%c0_34, %c0_35] : memref<64x128xf32, #tpu.memory_space<vmem>>, vector<64x128xf32>
    %cst_36 = arith.constant dense<0.000000e+00> : vector<8x128xf32>
    %66 = tpu.matmul %64, %65, %cst_36 {dimension_numbers = #tpu.dot_dimension_numbers<[1], [0], [0], [1], [0, 0, 1, 1], [], []>} : vector<8x64xf32>, vector<64x128xf32>, vector<8x128xf32> -> vector<8x128xf32>
    %c0_37 = arith.constant 0 : index
    %c0_38 = arith.constant 0 : index
    %67 = vector.load %arg13[%c0_37, %c0_38] : memref<1x128xf32, #tpu.memory_space<vmem>>, vector<1x128xf32>
    %68 = vector.broadcast %67 : vector<1x128xf32> to vector<8x128xf32>
    %69 = arith.addf %66, %68 : vector<8x128xf32>
    %cst_39 = arith.constant 0.000000e+00 : f32
    %70 = vector.broadcast %cst_39 : f32 to vector<8x128xf32>
    %71 = arith.cmpf ogt, %69, %70 : vector<8x128xf32>
    %cst_40 = arith.constant 0.000000e+00 : f32
    %72 = vector.broadcast %cst_40 : f32 to vector<8x128xf32>
    %73 = arith.minimumf %69, %72 : vector<8x128xf32>
    %74 = math.exp %73 : vector<8x128xf32>
    %cst_41 = arith.constant 1.000000e+00 : f32
    %75 = vector.broadcast %cst_41 : f32 to vector<8x128xf32>
    %76 = arith.subf %74, %75 : vector<8x128xf32>
    %77 = arith.select %71, %69, %76 : vector<8x128xi1>, vector<8x128xf32>
    %c0_42 = arith.constant 0 : index
    %c0_43 = arith.constant 0 : index
    %78 = vector.load %arg14[%c0_42, %c0_43] : memref<128x64xf32, #tpu.memory_space<vmem>>, vector<128x64xf32>
    %cst_44 = arith.constant dense<0.000000e+00> : vector<8x64xf32>
    %79 = tpu.matmul %77, %78, %cst_44 {dimension_numbers = #tpu.dot_dimension_numbers<[1], [0], [0], [1], [0, 0, 1, 1], [], []>} : vector<8x128xf32>, vector<128x64xf32>, vector<8x64xf32> -> vector<8x64xf32>
    %c0_45 = arith.constant 0 : index
    %c0_46 = arith.constant 0 : index
    %80 = vector.load %arg15[%c0_45, %c0_46] : memref<1x64xf32, #tpu.memory_space<vmem>>, vector<1x64xf32>
    %81 = vector.broadcast %80 : vector<1x64xf32> to vector<8x64xf32>
    %82 = arith.addf %79, %81 : vector<8x64xf32>
    %c0_47 = arith.constant 0 : index
    %c0_48 = arith.constant 0 : index
    %83 = vector.load %arg16[%c0_47, %c0_48] : memref<128x64xf32, #tpu.memory_space<vmem>>, vector<128x64xf32>
    %cst_49 = arith.constant dense<0.000000e+00> : vector<8x64xf32>
    %84 = tpu.matmul %77, %83, %cst_49 {dimension_numbers = #tpu.dot_dimension_numbers<[1], [0], [0], [1], [0, 0, 1, 1], [], []>} : vector<8x128xf32>, vector<128x64xf32>, vector<8x64xf32> -> vector<8x64xf32>
    %c0_50 = arith.constant 0 : index
    %c0_51 = arith.constant 0 : index
    %85 = vector.load %arg17[%c0_50, %c0_51] : memref<1x64xf32, #tpu.memory_space<vmem>>, vector<1x64xf32>
    %86 = vector.broadcast %85 : vector<1x64xf32> to vector<8x64xf32>
    %87 = arith.addf %84, %86 : vector<8x64xf32>
    %cst_52 = arith.constant 0.000000e+00 : f32
    %88 = vector.broadcast %cst_52 : f32 to vector<8x64xf32>
    %89 = arith.subf %88, %87 : vector<8x64xf32>
    %90 = math.exp %89 : vector<8x64xf32>
    %cst_53 = arith.constant 1.000000e+00 : f32
    %91 = vector.broadcast %cst_53 : f32 to vector<8x64xf32>
    %92 = arith.addf %91, %90 : vector<8x64xf32>
    %93 = tpu.reciprocal %92 {approx = true} : vector<8x64xf32> -> vector<8x64xf32>
    %94 = arith.mulf %82, %93 : vector<8x64xf32>
    %95 = arith.addf %64, %94 : vector<8x64xf32>
    %c0_54 = arith.constant 0 : index
    %c0_55 = arith.constant 0 : index
    %96 = vector.load %arg18[%c0_54, %c0_55] : memref<1x64xf32, #tpu.memory_space<vmem>>, vector<1x64xf32>
    %c0_56 = arith.constant 0 : index
    %c0_57 = arith.constant 0 : index
    %97 = vector.load %arg19[%c0_56, %c0_57] : memref<1x64xf32, #tpu.memory_space<vmem>>, vector<1x64xf32>
    %cst_58 = arith.constant dense<0.000000e+00> : vector<8xf32>
    %98 = vector.multi_reduction <add>, %95, %cst_58 [1] : vector<8x64xf32> to vector<8xf32>
    %99 = vector.shape_cast %98 : vector<8xf32> to vector<8x1xf32>
    %cst_59 = arith.constant 6.400000e+01 : f32
    %100 = vector.broadcast %cst_59 : f32 to vector<8x1xf32>
    %101 = arith.divf %99, %100 : vector<8x1xf32>
    %102 = vector.broadcast %101 : vector<8x1xf32> to vector<8x64xf32>
    %103 = arith.subf %95, %102 : vector<8x64xf32>
    %104 = arith.mulf %103, %103 : vector<8x64xf32>
    %cst_60 = arith.constant dense<0.000000e+00> : vector<8xf32>
    %105 = vector.multi_reduction <add>, %104, %cst_60 [1] : vector<8x64xf32> to vector<8xf32>
    %106 = vector.shape_cast %105 : vector<8xf32> to vector<8x1xf32>
    %cst_61 = arith.constant 6.400000e+01 : f32
    %107 = vector.broadcast %cst_61 : f32 to vector<8x1xf32>
    %108 = arith.divf %106, %107 : vector<8x1xf32>
    %cst_62 = arith.constant 9.99999974E-6 : f32
    %109 = vector.broadcast %cst_62 : f32 to vector<8x1xf32>
    %110 = arith.addf %108, %109 : vector<8x1xf32>
    %111 = math.rsqrt %110 : vector<8x1xf32>
    %112 = vector.broadcast %111 : vector<8x1xf32> to vector<8x64xf32>
    %113 = arith.mulf %103, %112 : vector<8x64xf32>
    %114 = vector.broadcast %96 : vector<1x64xf32> to vector<8x64xf32>
    %115 = arith.mulf %113, %114 : vector<8x64xf32>
    %116 = vector.broadcast %97 : vector<1x64xf32> to vector<8x64xf32>
    %117 = arith.addf %115, %116 : vector<8x64xf32>
    %118 = arith.addf %64, %117 : vector<8x64xf32>
    %c0_63 = arith.constant 0 : index
    %c0_64 = arith.constant 0 : index
    %119 = vector.load %arg20[%c0_63, %c0_64] : memref<1x64xf32, #tpu.memory_space<vmem>>, vector<1x64xf32>
    %c0_65 = arith.constant 0 : index
    %c0_66 = arith.constant 0 : index
    %120 = vector.load %arg21[%c0_65, %c0_66] : memref<1x64xf32, #tpu.memory_space<vmem>>, vector<1x64xf32>
    %cst_67 = arith.constant dense<0.000000e+00> : vector<8xf32>
    %121 = vector.multi_reduction <add>, %118, %cst_67 [1] : vector<8x64xf32> to vector<8xf32>
    %122 = vector.shape_cast %121 : vector<8xf32> to vector<8x1xf32>
    %cst_68 = arith.constant 6.400000e+01 : f32
    %123 = vector.broadcast %cst_68 : f32 to vector<8x1xf32>
    %124 = arith.divf %122, %123 : vector<8x1xf32>
    %125 = vector.broadcast %124 : vector<8x1xf32> to vector<8x64xf32>
    %126 = arith.subf %118, %125 : vector<8x64xf32>
    %127 = arith.mulf %126, %126 : vector<8x64xf32>
    %cst_69 = arith.constant dense<0.000000e+00> : vector<8xf32>
    %128 = vector.multi_reduction <add>, %127, %cst_69 [1] : vector<8x64xf32> to vector<8xf32>
    %129 = vector.shape_cast %128 : vector<8xf32> to vector<8x1xf32>
    %cst_70 = arith.constant 6.400000e+01 : f32
    %130 = vector.broadcast %cst_70 : f32 to vector<8x1xf32>
    %131 = arith.divf %129, %130 : vector<8x1xf32>
    %cst_71 = arith.constant 9.99999974E-6 : f32
    %132 = vector.broadcast %cst_71 : f32 to vector<8x1xf32>
    %133 = arith.addf %131, %132 : vector<8x1xf32>
    %134 = math.rsqrt %133 : vector<8x1xf32>
    %135 = vector.broadcast %134 : vector<8x1xf32> to vector<8x64xf32>
    %136 = arith.mulf %126, %135 : vector<8x64xf32>
    %137 = vector.broadcast %119 : vector<1x64xf32> to vector<8x64xf32>
    %138 = arith.mulf %136, %137 : vector<8x64xf32>
    %139 = vector.broadcast %120 : vector<1x64xf32> to vector<8x64xf32>
    %140 = arith.addf %138, %139 : vector<8x64xf32>
    %c0_72 = arith.constant 0 : index
    %c0_73 = arith.constant 0 : index
    %c0_74 = arith.constant 0 : index
    %141 = vector.load %arg22[%c0_72, %c0_73, %c0_74] : memref<1x8x64xf32, #tpu.memory_space<vmem>>, vector<1x8x64xf32>
    %142 = vector.shape_cast %141 : vector<1x8x64xf32> to vector<8x64xf32>
    %143 = vector.shape_cast %140 : vector<8x64xf32> to vector<1x8x64xf32>
    tpu.vector_store %arg22[%c0_72, %c0_73, %c0_74], %143 {strides = array<i32>} : memref<1x8x64xf32, #tpu.memory_space<vmem>>, vector<1x8x64xf32>,
    return
  }
  func.func @transform_0(%arg0: i32) -> (i32, i32, i32) {
    %c0_i32 = arith.constant 0 : i32
    %c0_i32_0 = arith.constant 0 : i32
    %c0_i32_1 = arith.constant 0 : i32
    return %arg0, %c0_i32, %c0_i32_0 : i32, i32, i32
  }
  func.func @transform_1(%arg0: i32) -> (i32, i32) {
    %c0_i32 = arith.constant 0 : i32
    %c0_i32_0 = arith.constant 0 : i32
    %c0_i32_1 = arith.constant 0 : i32
    return %c0_i32, %c0_i32_0 : i32, i32
  }
  func.func @transform_2(%arg0: i32) -> (i32, i32) {
    %c0_i32 = arith.constant 0 : i32
    %c0_i32_0 = arith.constant 0 : i32
    %c0_i32_1 = arith.constant 0 : i32
    return %c0_i32, %c0_i32_0 : i32, i32
  }
  func.func @transform_3(%arg0: i32) -> (i32, i32) {
    %c0_i32 = arith.constant 0 : i32
    %c0_i32_0 = arith.constant 0 : i32
    %c0_i32_1 = arith.constant 0 : i32
    return %c0_i32, %c0_i32_0 : i32, i32
  }
  func.func @transform_4(%arg0: i32) -> (i32, i32) {
    %c0_i32 = arith.constant 0 : i32
    %c0_i32_0 = arith.constant 0 : i32
    %c0_i32_1 = arith.constant 0 : i32
    return %c0_i32, %c0_i32_0 : i32, i32
  }
  func.func @transform_5(%arg0: i32) -> (i32, i32) {
    %c0_i32 = arith.constant 0 : i32
    %c0_i32_0 = arith.constant 0 : i32
    %c0_i32_1 = arith.constant 0 : i32
    return %c0_i32, %c0_i32_0 : i32, i32
  }
  func.func @transform_6(%arg0: i32) -> (i32, i32) {
    %c0_i32 = arith.constant 0 : i32
    %c0_i32_0 = arith.constant 0 : i32
    %c0_i32_1 = arith.constant 0 : i32
    return %c0_i32, %c0_i32_0 : i32, i32
  }
  func.func @transform_7(%arg0: i32) -> (i32, i32) {
    %c0_i32 = arith.constant 0 : i32
    %c0_i32_0 = arith.constant 0 : i32
    %c0_i32_1 = arith.constant 0 : i32
    return %c0_i32, %c0_i32_0 : i32, i32
  }
  func.func @transform_8(%arg0: i32) -> (i32, i32) {
    %c0_i32 = arith.constant 0 : i32
    %c0_i32_0 = arith.constant 0 : i32
    %c0_i32_1 = arith.constant 0 : i32
    return %c0_i32, %c0_i32_0 : i32, i32
  }
  func.func @transform_9(%arg0: i32) -> (i32, i32) {
    %c0_i32 = arith.constant 0 : i32
    %c0_i32_0 = arith.constant 0 : i32
    %c0_i32_1 = arith.constant 0 : i32
    return %c0_i32, %c0_i32_0 : i32, i32
  }
  func.func @transform_10(%arg0: i32) -> (i32, i32) {
    %c0_i32 = arith.constant 0 : i32
    %c0_i32_0 = arith.constant 0 : i32
    %c0_i32_1 = arith.constant 0 : i32
    return %c0_i32, %c0_i32_0 : i32, i32
  }
  func.func @transform_11(%arg0: i32) -> (i32, i32) {
    %c0_i32 = arith.constant 0 : i32
    %c0_i32_0 = arith.constant 0 : i32
    %c0_i32_1 = arith.constant 0 : i32
    return %c0_i32, %c0_i32_0 : i32, i32
  }
  func.func @transform_12(%arg0: i32) -> (i32, i32) {
    %c0_i32 = arith.constant 0 : i32
    %c0_i32_0 = arith.constant 0 : i32
    %c0_i32_1 = arith.constant 0 : i32
    return %c0_i32, %c0_i32_0 : i32, i32
  }
  func.func @transform_13(%arg0: i32) -> (i32, i32) {
    %c0_i32 = arith.constant 0 : i32
    %c0_i32_0 = arith.constant 0 : i32
    %c0_i32_1 = arith.constant 0 : i32
    return %c0_i32, %c0_i32_0 : i32, i32
  }
  func.func @transform_14(%arg0: i32) -> (i32, i32) {
    %c0_i32 = arith.constant 0 : i32
    %c0_i32_0 = arith.constant 0 : i32
    %c0_i32_1 = arith.constant 0 : i32
    return %c0_i32, %c0_i32_0 : i32, i32
  }
  func.func @transform_15(%arg0: i32) -> (i32, i32) {
    %c0_i32 = arith.constant 0 : i32
    %c0_i32_0 = arith.constant 0 : i32
    %c0_i32_1 = arith.constant 0 : i32
    return %c0_i32, %c0_i32_0 : i32, i32
  }
  func.func @transform_16(%arg0: i32) -> (i32, i32) {
    %c0_i32 = arith.constant 0 : i32
    %c0_i32_0 = arith.constant 0 : i32
    %c0_i32_1 = arith.constant 0 : i32
    return %c0_i32, %c0_i32_0 : i32, i32
  }
  func.func @transform_17(%arg0: i32) -> (i32, i32) {
    %c0_i32 = arith.constant 0 : i32
    %c0_i32_0 = arith.constant 0 : i32
    %c0_i32_1 = arith.constant 0 : i32
    return %c0_i32, %c0_i32_0 : i32, i32
  }
  func.func @transform_18(%arg0: i32) -> (i32, i32) {
    %c0_i32 = arith.constant 0 : i32
    %c0_i32_0 = arith.constant 0 : i32
    %c0_i32_1 = arith.constant 0 : i32
    return %c0_i32, %c0_i32_0 : i32, i32
  }
  func.func @transform_19(%arg0: i32) -> (i32, i32) {
    %c0_i32 = arith.constant 0 : i32
    %c0_i32_0 = arith.constant 0 : i32
    %c0_i32_1 = arith.constant 0 : i32
    return %c0_i32, %c0_i32_0 : i32, i32
  }
  func.func @transform_20(%arg0: i32) -> (i32, i32) {
    %c0_i32 = arith.constant 0 : i32
    %c0_i32_0 = arith.constant 0 : i32
    %c0_i32_1 = arith.constant 0 : i32
    return %c0_i32, %c0_i32_0 : i32, i32
  }
  func.func @transform_21(%arg0: i32) -> (i32, i32, i32) {
    %c0_i32 = arith.constant 0 : i32
    %c0_i32_0 = arith.constant 0 : i32
    %c0_i32_1 = arith.constant 0 : i32
    return %arg0, %c0_i32, %c0_i32_0 : i32, i32, i32
  }
}

</mosaic_0001>

<bundles_post_ra>
// kernel: tpu_custom_call.1
= control target key start
LH: loop header
LB: loop body
LE: loop exit
PB: predicated region body
PF: predicated region fallthrough
CT: control target
= control target key end

     0   :  { %s4117_s0 = inlined_call_operand.hbm [shape: f32[2,8,64], index: 0, kind: input, shape index: {}]   ;;  %s4118_s1 = inlined_call_operand.vmem [shape: f32[64,64], index: 1, kind: input, shape index: {}]   ;;  %s4119_s2 = inlined_call_operand.vmem [shape: f32[1,64], index: 2, kind: input, shape index: {}]   ;;  %s4120_s3 = inlined_call_operand.vmem [shape: f32[64,64], index: 3, kind: input, shape index: {}]   ;;  %s4121_s4 = inlined_call_operand.vmem [shape: f32[1,64], index: 4, kind: input, shape index: {}]   ;;  %s4122_s5 = inlined_call_operand.vmem [shape: f32[64,64], index: 5, kind: input, shape index: {}]   ;;  %s4123_s6 = inlined_call_operand.vmem [shape: f32[1,64], index: 6, kind: input, shape index: {}]   ;;  %s4124_s7 = inlined_call_operand.vmem [shape: f32[64,64], index: 7, kind: input, shape index: {}]   ;;  %s4125_s8 = inlined_call_operand.vmem [shape: f32[1,64], index: 8, kind: input, shape index: {}]   ;;  %s4126_s9 = inlined_call_operand.vmem [shape: f32[1,64], index: 9, kind: input, shape index: {}]   ;;  %s4127_s10 = inlined_call_operand.vmem [shape: f32[1,64], index: 10, kind: input, shape index: {}]   ;;  %s4128_s11 = inlined_call_operand.vmem [shape: f32[64,128], index: 11, kind: input, shape index: {}]   ;;  %s4129_s12 = inlined_call_operand.vmem [shape: f32[1,128], index: 12, kind: input, shape index: {}]   ;;  %s4130_s13 = inlined_call_operand.vmem [shape: f32[128,64], index: 13, kind: input, shape index: {}]   ;;  %s4131_s14 = inlined_call_operand.vmem [shape: f32[1,64], index: 14, kind: input, shape index: {}]   ;;  %s4132_s15 = inlined_call_operand.vmem [shape: f32[128,64], index: 15, kind: input, shape index: {}]   ;;  %s4133_s16 = inlined_call_operand.vmem [shape: f32[1,64], index: 16, kind: input, shape index: {}]   ;;  %s4134_s17 = inlined_call_operand.vmem [shape: f32[1,64], index: 17, kind: input, shape index: {}]   ;;  %s4135_s18 = inlined_call_operand.vmem [shape: f32[1,64], index: 18, kind: input, shape index: {}]   ;;  %s4136_s19 = inlined_call_operand.vmem [shape: f32[1,64], index: 19, kind: input, shape index: {}]   ;;  %s4137_s20 = inlined_call_operand.vmem [shape: f32[1,64], index: 20, kind: input, shape index: {}]   ;;  %s4138_s21 = inlined_call_operand.hbm [shape: f32[2,8,64], index: 21, kind: output, shape index: {}]  }
   0x1   :  { %4157 = sst [smem:[#allocation14_spill]] %s4117_s0 }
   0x2   :  { %4158 = sst [smem:[#allocation15_spill]] %s4118_s1 }
   0x3   :  { %4159 = sst [smem:[#allocation16_spill]] %s4119_s2 }
   0x4   :  { %4160 = sst [smem:[#allocation17_spill]] %s4120_s3 }
   0x5   :  { %4161 = sst [smem:[#allocation18_spill]] %s4121_s4 }
   0x6   :  { %4162 = sst [smem:[#allocation19_spill]] %s4122_s5 }
   0x7   :  { %4163 = sst [smem:[#allocation20_spill]] %s4123_s6 }
   0x8   :  { %4164 = sst [smem:[#allocation21_spill]] %s4124_s7 }
   0x9   :  { %4165 = sst [smem:[#allocation22_spill]] %s4136_s19 }
   0xa   :  { %4166 = sst [smem:[#allocation23_spill]] %s4137_s20 }
   0xb   :  { %4167 = sst [smem:[#allocation24_spill]] %s4138_s21 }
   0xc   :  { %26 = vsyncpa [#allocation3], 0 }
   0xd   :  { %28 = vsyncpa [#allocation3 + $0x1], 0 }
   0xe   :  { %29 = vsyncpa [#allocation4], 0 }
   0xf   :  { %31 = vsyncpa [#allocation4 + $0x1], 0  ;;  %s3480_s2 = smov 0   ;;  %s3482_s25 = smov 0  }
  0x10   :  { %s3484_s26 = smov 0   ;;  %s3486_s27 = smov 0  }
  0x11 LB: > { %4168 = sst [smem:[#allocation8_spill]] %s3343_s2  ;;  %s3501_s3 = sadd.s32 4294967295, %s3355_s27   ;;  %s3355_s27 = sphi %s3486_s27, %s4200_s27   ;;  %s3351_s26 = sphi %s3484_s26, %s4203_s26   ;;  %s3347_s25 = sphi %s3482_s25, %s4202_s25   ;;  %s3343_s2 = sphi %s3480_s2, %s4201_s2  }
  0x12   : > { %4169 = sst [smem:[#allocation9_spill]] %s3347_s25  ;;  %s2715_s28 = sadd.s32 4294967294, %s3355_s27  }
  0x13   : > { %4170 = sst [smem:[#allocation10_spill]] %s3351_s26  ;;  %s3505_s29 = sadd.s32 1, %s3355_s27  }
  0x14   : > { %4171 = sst [smem:[#allocation11_spill]] %s3505_s29  ;;  %s44_s0 = sadd.s32 1, %s3351_s26 }
  0x15   : > { %s41_s4 = ssub.s32 %s3355_s27, %s3505_s29  ;;  %p51_p0 = scmp.ne.s32.totalorder %s3351_s26, %s3347_s25 }
  0x16   : > { %p42_p1 = scmp.eq.s32.totalorder %s41_s4, 0  ;;  %p52_p2 = scmp.eq.s32.totalorder %s3355_s27, 0 }
  0x17   : > { %p57_p3 = scmp.ne.s32.totalorder %s3347_s25, %s3343_s2  ;;  %p58_p4 = scmp.eq.s32.totalorder %s3501_s3, 0 }
  0x18   : > { %s3517_s30 = scalar_select %p42_p1, %s3351_s26, %s44_s0  }
  0x19   : > { %p3519_p5 = por %p52_p2, %p51_p0  ;;  %p3523_p6 = por %p58_p4, %p57_p3 }
  0x1a   : > { %4172 = sst [smem:[#allocation12_spill]] %s3517_s30  ;;  %p501_p7 = scmp.eq.s32.totalorder %s3501_s3, 1 }
  0x1b   : > { %p507_p8 = scmp.eq.s32.totalorder %s2715_s28, 1  ;;  %p3186_p10 = scmp.lt.s32.totalorder %s3355_s27, 2 }
  0x1c   : > { %p3530_p11 = por %p501_p7, %p51_p0  ;;  %s587_s24 = sand.u32 1, %s3351_s26  }
  0x1d   : > { %p3534_p12 = por %p507_p8, %p57_p3  ;;  %s2719_s0 = sshll.u32 %s3355_s27, 7 }
  0x1e   : > { %s4175_s23 = scalar_select %p3530_p11, 1, 0 }
  0x1f   : > { %s4177_s1 = scalar_select %p3534_p12, 1, 0 }
  0x20   : > { %4176 = sst [smem:[#allocation13_spill]] %s4175_s23  ;;  %s2718_s4 = sshll.u32 %s587_s24, 3 }
  0x21   : > { %s4178_s2 = sld [smem:[#allocation14_spill]]  ;;  %s591_s28 = scalar_lea.vmem [#allocation2], %s2718_s4 }
  0x22   : > { %s598_s19 = sshll.u32 %s591_s28, 4  ;;  %p3547_p13 = pnand %p3186_p10, %p3519_p5  ;;  %s3551_s19 = int_to_ptr.vmem [resolvable:$true] %s598_s19 }
  0x23   : > { %s588_s29 = scalar_lea.sflag [#allocation3], %s587_s24 }
  0x24   : > { %p3261_p3 = pneg %p3547_p13 }
  0x27   : > { %s4179_s21 = smov %s4178_s2  ;;  %s3543_s20 = scalar_lea.hbm %s4178_s2, %s2719_s0 }
  0x28   : > { %s3259_s2 = scalar_lea.hbm %s3543_s20, 128  ;;  %s3264_s0 = scalar_lea.hbm %s4179_s21, 256 }
  0x29   : > { %p3260_p2 = scmp.ne.s32.totalorder %s3543_s20, %s3259_s2  ;;  %p3265_p5 = scmp.lt.u32.totalorder %s3543_s20, %s4179_s21 }
  0x2a   : > { %p3266_p8 = scmp.lt.u32.totalorder %s3264_s0, %s3259_s2  ;;  %p3268_p9 = scmp.lt.u32.totalorder %s3259_s2, %s3543_s20 }
  0x2b   : > { %p3262_p4 = pnand %p3261_p3, %p3260_p2 }
  0x2c   : > { %p3267_p10 = por %p3266_p8, %p3265_p5 }
  0x2d   : > { %p3263_p7 = pneg %p3262_p4 }
  0x2e   : > { %p3269_p0 = por %p3268_p9, %p3267_p10 }
  0x30   : > { %p3270_p1 = pnand %p3269_p0, %p3263_p7 }
  0x32   : > { %3273 = shalt.err (!%p3270_p1)
}
  0x33   : > { %s3274_s24 = scalar_lea.vmem %s3551_s19, 128  ;;  %s3357_s30 = smov [#allocation2]  }
  0x34   : > { %p3275_p2 = scmp.ne.s32.totalorder %s3551_s19, %s3274_s24  ;;  %s3279_s5 = sshll.u32 %s3357_s30, 4  ;;  %s3280_s5 = int_to_ptr.vmem [resolvable:$false] %s3279_s5 }
  0x35   : > { %s3281_s4 = scalar_lea.vmem %s3280_s5, 256  ;;  %p3282_p11 = scmp.lt.s32.totalorder %s3551_s19, %s3280_s5 }
  0x36   : > { %p3277_p4 = pnand %p3275_p2, %p3261_p3  ;;  %p3283_p5 = scmp.lt.s32.totalorder %s3281_s4, %s3274_s24 }
  0x38   : > { %p3278_p12 = pneg %p3277_p4  ;;  %p3284_p8 = por %p3283_p5, %p3282_p11 }
  0x3a   : > { %p3285_p9 = pnand %p3284_p8, %p3278_p12 }
  0x3c   : > { %3288 = shalt.err (!%p3285_p9)
}
  0x3d   : > { %3181 = dma.hbm_to_vmem [thread:$0]  (!%p3547_p13), %s3543_s20, 128, %s3551_s19, %s588_s29  }
  0x3e   : > { %p4181_p0 = scmp.lt.s32.totalorder %s3355_s27, 3  ;;  %p4182_p1 = scmp.ge.s32.totalorder %s3355_s27, 1 }
  0x40   : > { %p604_p3 = pnand %p4182_p1, %p4181_p0 }
  0x41   : > { %s3585_s2 = sand.u32 (!%p604_p3), 1, %s3347_s25  }
  0x42   : > { %607 = sbr.rel (%p604_p3) target bundleno = 3005 (0xbbd), region = 104  ;;  %s4150_s0 = sshll.u32 (!%p604_p3), %s3585_s2, 3 }
  0x43   : > { %s610_s28 = scalar_lea.sflag (!%p604_p3), [#allocation3], %s3585_s2  ;;  %s3591_s23 = scalar_lea.vmem (!%p604_p3), [#allocation2], %s4150_s0 }
  0x49   : > { %3334 = dma.done.wait (%p3523_p6), %s610_s28, 128  }
  0x4a   : > { %3336 = vsyncadd (%p3523_p6), %s610_s28, 4294967168  ;;  %v3358_v0 = vmov 0.0|0.0   ;;  %vm3359_vm0 = vmmov 0   ;;  %v3360_v1 = vmov 0.0   ;;  %s4183_s29 = sld [smem:[#allocation17_spill]]  ;;  %s4184_s4 = sld [smem:[#allocation15_spill]]  ;;  %v947_v49 = vlaneseq }
  0x4b   : > { %3078 = vmatprep.subr.bf16.mxu1 %v3358_v0  ;;  %3066 = vmatprep.subr.bf16.mxu0 %v3358_v0  ;;  %v3658_v26 = vld [vmem:[%s3591_s23] sm:$0xff]  ;;  %vm688_vm1 = vcmask 523264   ;;  %s4185_s19 = sld [smem:[#allocation18_spill]]  ;;  %s4186_s22 = sld [smem:[#allocation16_spill]]  ;;  %v3364_v47 = vmov 1983009808  }
  0x4c   : > { %2896 = vmatprep.mubr.msk.f32.mxu1 %vm3359_vm0, %v3360_v1  ;;  %2877 = vmatprep.mubr.msk.f32.mxu0 %vm3359_vm0, %v3360_v1  ;;  %s3361_s30 = smov 80   ;;  %s3362_s21 = smov 112   ;;  %v945_v48 = vunpack.c.l.s4 %v3364_v47  ;;  %v3365_v50 = vmov 1934713408   ;;  %v948_v53 = vshrl.u32 %v947_v49, 7  ;;  %vm1370_vm2 = vcmask 130048  }
  0x4d   : > { %s4154_s26 = smov 96   ;;  %s4187_s5 = sld [smem:[#allocation19_spill]]  ;;  %v977_v51 = vunpack.c.l.s4 %v3365_v50  ;;  %vm1675_vm3 = vcmask 64512   ;;  %vm2161_vm4 = vcmask 261120   ;;  %vm2163_vm5 = vcmask 392192  }
  0x4e   : > { %v946_v52 = vunpack.c.0.s8 %v945_v48  ;;  %s4188_s6 = sld [smem:[#allocation20_spill]]  ;;  %s4190_s7 = sld [smem:[#allocation21_spill]] }
  0x4f   : > { %v978_v56 = vunpack.c.0.s8 %v977_v51  ;;  %s3367_s20 = smov 16   ;;  %s3368_s24 = smov 48  }
  0x50   : > { %v762_v2 = vld [vmem:[%s4183_s29] sm:$0xff]  ;;  %v763_v3 = vld [vmem:[%s4183_s29 + $0x8] sm:$0xff]  ;;  %v764_v7 = vld [vmem:[%s4183_s29 + $0x10] sm:$0xff]  ;;  %v3719_v57 = vsub.s32 %v946_v52, %v948_v53  ;;  %s2763_s25 = sshll.u32 %s3501_s3, 7  ;;  %s4194_s0 = sshll.u32 %s3585_s2, 3 }
  0x51   : > { %v673_v4 = vld [vmem:[%s4184_s4] sm:$0xff]  ;;  %v3079_v5 = vpack.c.bf16 %v763_v3, %v762_v2  ;;  %v674_v6 = vld [vmem:[%s4184_s4 + $0x8] sm:$0xff]  ;;  %v765_v8 = vld [vmem:[%s4183_s29 + $0x18] sm:$0xff]  ;;  %v3721_v2 = vsub.s32 %v978_v56, %v948_v53  ;;  %s671_s23 = scalar_lea.vmem [#allocation5], %s4194_s0  ;;  %s3369_s3 = smov [#allocation5]  }
  0x52   : > { %v3067_v9 = vpack.c.bf16 %v674_v6, %v673_v4  ;;  %v675_v10 = vld [vmem:[%s4184_s4 + $0x10] sm:$0xff]  ;;  %v676_v11 = vld [vmem:[%s4184_s4 + $0x18] sm:$0xff]  ;;  %v3082_v12 = vpack.c.bf16 %v765_v8, %v764_v7  ;;  %v766_v14 = vld [vmem:[%s4183_s29 + $0x20] sm:$0xff]  ;;  %s2645_s28 = sshll.u32 %s671_s23, 4  ;;  %s4074_s28 = int_to_ptr.vmem [resolvable:$true] %s2645_s28 }
  0x53   : > { %3080 = vmatpush3.bf16.msra.mxu1 %v3079_v5  ;;  %v3070_v13 = vpack.c.bf16 %v676_v11, %v675_v10  ;;  %v767_v15 = vld [vmem:[%s4183_s29 + $0x28] sm:$0xff]  ;;  %v677_v16 = vld [vmem:[%s4184_s4 + $0x20] sm:$0xff]  ;;  %v768_v20 = vld [vmem:[%s4183_s29 + $0x30] sm:$0xff] }
  0x54   : > { %3068 = vmatpush3.bf16.msra.mxu0 %v3067_v9  ;;  %3081 = vmatprep.subr.bf16.mxu1 %v3358_v0  ;;  %v678_v17 = vld [vmem:[%s4184_s4 + $0x28] sm:$0xff]  ;;  %v3085_v18 = vpack.c.bf16 %v767_v15, %v766_v14  ;;  %v769_v21 = vld [vmem:[%s4183_s29 + $0x38] sm:$0xff]  ;;  %v679_v22 = vld [vmem:[%s4184_s4 + $0x30] sm:$0xff] }
  0x55   : > { %3069 = vmatprep.subr.bf16.mxu0 %v3358_v0  ;;  %v3073_v19 = vpack.c.bf16 %v678_v17, %v677_v16  ;;  %v680_v23 = vld [vmem:[%s4184_s4 + $0x38] sm:$0xff]  ;;  %v3088_v24 = vpack.c.bf16 %v769_v21, %v768_v20  ;;  %v2725_v27 = vld [vmem:[%s4185_s19] ss:$0 sm:$0xff]  ;;  %v848_v36 = vld [vmem:[%s4187_s5 + $0x8] sm:$0xff]  ;;  %s3366_s19 = smov 32  }
  0x56   : > { %v3076_v25 = vpack.c.bf16 %v680_v23, %v679_v22  ;;  %v2723_v29 = vld [vmem:[%s4186_s22] ss:$0 sm:$0xff]  ;;  %v849_v37 = vld [vmem:[%s4187_s5 + $0x10] sm:$0xff]  ;;  %v850_v39 = vld [vmem:[%s4187_s5 + $0x18] sm:$0xff] }
  0x57   : > { %3083 = vmatpush3.bf16.msra.mxu1 %v3082_v12  ;;  %v847_v35 = vld [vmem:[%s4187_s5] sm:$0xff]  ;;  %v3094_v40 = vpack.c.bf16 %v850_v39, %v849_v37  ;;  %v852_v42 = vld [vmem:[%s4187_s5 + $0x28] sm:$0xff]  ;;  %v853_v44 = vld [vmem:[%s4187_s5 + $0x30] sm:$0xff] }
  0x58   : > { %3071 = vmatpush3.bf16.msra.mxu0 %v3070_v13  ;;  %3084 = vmatprep.subr.bf16.mxu1 %v3358_v0  ;;  %v3091_v38 = vpack.c.bf16 %v848_v36, %v847_v35  ;;  %v851_v41 = vld [vmem:[%s4187_s5 + $0x20] sm:$0xff]  ;;  %v854_v45 = vld [vmem:[%s4187_s5 + $0x38] sm:$0xff] }
  0x59   : > { %3072 = vmatprep.subr.bf16.mxu0 %v3358_v0  ;;  %v3097_v43 = vpack.c.bf16 %v852_v42, %v851_v41  ;;  %v3100_v46 = vpack.c.bf16 %v854_v45, %v853_v44 }
  0x5b   : > { %3086 = vmatpush3.bf16.msra.mxu1 %v3085_v18 }
  0x5c   : > { %3074 = vmatpush3.bf16.msra.mxu0 %v3073_v19  ;;  %3087 = vmatprep.subr.bf16.mxu1 %v3358_v0 }
  0x5d   : > { %3075 = vmatprep.subr.bf16.mxu0 %v3358_v0 }
  0x5f   : > { %3089 = vmatpush3.bf16.msra.mxu1 %v3088_v24 }
  0x60   : > { %3077 = vmatpush3.bf16.msra.mxu0 %v3076_v25  ;;  %2918 = vmatprep.subr.mxu1 %v3360_v1 }
  0x61   : > { %3090 = vmatprep.subr.bf16.mxu0 %v3358_v0 }
  0x62   : > { %2897 = vmatmul.mubr.msk.f32.vlgmr.msra.gmra.mrb[0].mxu1 %vm688_vm1, %v3658_v26 }
  0x63   : > { %2878 = vmatmul.mubr.msk.f32.vlgmr.msra.gmra.mrb[0].mxu0 %vm688_vm1, %v3658_v26  ;;  %2920 = vmatprep.mubr.msk.f32.mxu1 %vm3359_vm0, %v3360_v1 }
  0x64   : > { %2915 = vmatprep.mubr.msk.f32.mxu0 %vm3359_vm0, %v3360_v1  ;;  %3092 = vmatpush3.bf16.msra.mxu0 %v3091_v38 }
  0x65   : > { %3093 = vmatprep.subr.bf16.mxu0 %v3358_v0 }
  0x68   : > { %3095 = vmatpush3.bf16.msra.mxu0 %v3094_v40 }
  0x69   : > { %3096 = vmatprep.subr.bf16.mxu0 %v3358_v0 }
  0x6c   : > { %3098 = vmatpush3.bf16.msra.mxu0 %v3097_v43 }
  0x6d   : > { %3099 = vmatprep.subr.bf16.mxu0 %v3358_v0 }
  0x70   : > { %3101 = vmatpush3.bf16.msra.mxu0 %v3100_v46 }
  0x71   : > { %2938 = vmatprep.subr.mxu0 %v3360_v1 }
  0x73   : > { %2916 = vmatmul.mubr.msk.f32.vlgmr.msra.gmra.mrb[2].mxu0 %vm688_vm1, %v3658_v26 }
  0x74   : > { %2940 = vmatprep.mubr.msk.f32.mxu0 %vm3359_vm0, %v3360_v1 }
 0x135   : > { %v843_v28 = vpop.f32.mrb[0].mxu1 }
 0x136   : > { %v844_v30 = vadd.f32 %v2725_v27, %v843_v28  ;;  %v2898_v31 = vpop.f32.mrb[1].mxu1  ;;  %v758_v32 = vpop.f32.mrb[0].mxu0 }
 0x137   : > { %v2879_v33 = vpop.f32.mrb[1].mxu0  ;;  %v3678_v34 = vadd.f32 %v2723_v29, %v758_v32 }
 0x138   : > { %1085 = vrot.lane.b32.xlu1 %v844_v30, %s3361_s30  ;;  %1079 = vrot.lane.b32.xlu0 %v844_v30, %s3362_s21 }
 0x13c   : > { %1082 = vrot.lane.b32.xlu0 %v844_v30, %s4154_s26  ;;  %933 = vrot.lane.b32.xlu1 %v3678_v34, %s3362_s21 }
 0x140   : > { %936 = vrot.lane.b32.xlu0 %v3678_v34, %s4154_s26  ;;  %939 = vrot.lane.b32.xlu1 %v3678_v34, %s3361_s30  ;;  %s4192_s26 = sld [smem:[#allocation22_spill]] }
 0x1aa   : > { %v1086_v54 = vpop.permute.xlu1 %1085  ;;  %v1080_v55 = vpop.permute.xlu0 %1079 }
 0x1ab   : > { %v1104_v58 = vcombine.low %v1080_v55, %v1086_v54  ;;  %v1105_v59 = vcombine.high %v1080_v55, %v1086_v54 }
 0x1ad   : > { %v1112_v3 = vrot.slane %v1104_v58, %v3719_v57  ;;  %v1119_v4 = vrot.slane %v1105_v59, %v3719_v57 }
 0x1ae   : > { %v1083_v60 = vpop.permute.xlu0 %1082  ;;  %v934_v61 = vpop.permute.xlu1 %933 }
 0x1af   : > { %v1088_v62 = vcombine.low %v844_v30, %v1083_v60  ;;  %v1089_v63 = vcombine.high %v844_v30, %v1083_v60 }
 0x1b1   : > { %v1096_v5 = vrot.slane %v1088_v62, %v3719_v57  ;;  %v1103_v6 = vrot.slane %v1089_v63, %v3719_v57 }
 0x1b2   : > { %v937_v7 = vpop.permute.xlu0 %936  ;;  %v940_v8 = vpop.permute.xlu1 %939 }
 0x1b3   : > { %v1120_v9 = vcombine.low %v1096_v5, %v1112_v3  ;;  %v1121_v10 = vcombine.high %v1096_v5, %v1112_v3  ;;  %v1136_v11 = vcombine.low %v1103_v6, %v1119_v4  ;;  %v1137_v12 = vcombine.high %v1103_v6, %v1119_v4 }
 0x1b4   : > { %v942_v13 = vcombine.low %v3678_v34, %v937_v7  ;;  %v943_v14 = vcombine.high %v3678_v34, %v937_v7  ;;  %v958_v15 = vcombine.low %v934_v61, %v940_v8  ;;  %v959_v16 = vcombine.high %v934_v61, %v940_v8 }
 0x1b5   : > { %v1128_v17 = vrot.slane %v1120_v9, %v3721_v2  ;;  %v1135_v18 = vrot.slane %v1121_v10, %v3721_v2  ;;  %v1144_v19 = vrot.slane %v1136_v11, %v3721_v2  ;;  %v1151_v20 = vrot.slane %v1137_v12, %v3721_v2 }
 0x1b6   : > { %v950_v21 = vrot.slane %v942_v13, %v3719_v57  ;;  %v957_v22 = vrot.slane %v943_v14, %v3719_v57  ;;  %v966_v23 = vrot.slane %v958_v15, %v3719_v57  ;;  %v973_v24 = vrot.slane %v959_v16, %v3719_v57  ;;  %v928_v14 = vpop.f32.mrb[2].mxu0 }
 0x1b7   : > { %v1156_v25 = vcombine.low %v1128_v17, %v1135_v18  ;;  %v2731_v27 = vcombine.high %v1128_v17, %v1135_v18  ;;  %v1172_v28 = vcombine.low %v1144_v19, %v1151_v20  ;;  %v2732_v29 = vcombine.high %v1144_v19, %v1151_v20  ;;  %v2917_v15 = vpop.f32.mrb[3].mxu0 }
 0x1b8   : > { %v974_v30 = vcombine.low %v950_v21, %v966_v23  ;;  %v975_v31 = vcombine.high %v950_v21, %v966_v23  ;;  %v990_v32 = vcombine.low %v957_v22, %v973_v24  ;;  %v991_v33 = vcombine.high %v957_v22, %v973_v24 }
 0x1b9   : > { %v1163_v34 = vrot.slane %v1156_v25, %v3719_v57  ;;  %v1171_v35 = vrot.slane %v2731_v27, %v3719_v57  ;;  %v1179_v36 = vrot.slane %v1172_v28, %v3719_v57  ;;  %v1187_v37 = vrot.slane %v2732_v29, %v3719_v57  ;;  %v2727_v29 = vld [vmem:[%s4188_s6] ss:$0 sm:$0xff]  ;;  %s4195_s6 = sld [smem:[#allocation24_spill]] }
 0x1ba   : > { %v982_v38 = vrot.slane %v974_v30, %v3721_v2  ;;  %v989_v39 = vrot.slane %v975_v31, %v3721_v2  ;;  %v998_v40 = vrot.slane %v990_v32, %v3721_v2  ;;  %v1005_v41 = vrot.slane %v991_v33, %v3721_v2 }
 0x1bb   : > { %v1188_v42 = vcombine.low %v1163_v34, %v1171_v35  ;;  %v1204_v43 = vcombine.low %v1179_v36, %v1187_v37  ;;  %v1189_v58 = vcombine.high %v1163_v34, %v1171_v35  ;;  %v1205_v59 = vcombine.high %v1179_v36, %v1187_v37 }
 0x1bc   : > { %v1010_v44 = vcombine.low %v982_v38, %v989_v39  ;;  %v2729_v45 = vcombine.high %v982_v38, %v989_v39  ;;  %v1026_v46 = vcombine.low %v998_v40, %v1005_v41  ;;  %v2730_v47 = vcombine.high %v998_v40, %v1005_v41 }
 0x1bd   : > { %v1196_v48 = vrot.slane %v1188_v42, %v3721_v2  ;;  %v1212_v49 = vrot.slane %v1204_v43, %v3721_v2  ;;  %v1203_v5 = vrot.slane %v1189_v58, %v3721_v2  ;;  %v1219_v6 = vrot.slane %v1205_v59, %v3721_v2 }
 0x1be   : > { %v1017_v50 = vrot.slane %v1010_v44, %v3719_v57  ;;  %v1025_v51 = vrot.slane %v2729_v45, %v3719_v57  ;;  %v1033_v52 = vrot.slane %v1026_v46, %v3719_v57  ;;  %v1041_v53 = vrot.slane %v2730_v47, %v3719_v57 }
 0x1bf   : > { %v1220_v54 = vcombine.low %v1196_v48, %v1212_v49  ;;  %v1221_v4 = vcombine.high %v1196_v48, %v1212_v49  ;;  %v1222_v10 = vcombine.low %v1203_v5, %v1219_v6  ;;  %v1223_v12 = vcombine.high %v1203_v5, %v1219_v6 }
 0x1c0   : > { %v1042_v55 = vcombine.low %v1017_v50, %v1025_v51  ;;  %v1058_v56 = vcombine.low %v1033_v52, %v1041_v53  ;;  %v1043_v62 = vcombine.high %v1017_v50, %v1025_v51  ;;  %v1059_v63 = vcombine.high %v1033_v52, %v1041_v53 }
 0x1c1   : > { %2919 = vmatpush3.xpose.msk.msra.mxu1 %vm1370_vm2, %v1220_v54  ;;  %v929_v30 = vadd.f32 %v2727_v29, %v928_v14 }
 0x1c2   : > { %2923 = vmatprep.subr.mxu1 %v3360_v1  ;;  %v1050_v60 = vrot.slane %v1042_v55, %v3721_v2  ;;  %v1066_v61 = vrot.slane %v1058_v56, %v3721_v2  ;;  %v1057_v8 = vrot.slane %v1043_v62, %v3721_v2  ;;  %v1073_v9 = vrot.slane %v1059_v63, %v3721_v2 }
 0x1c4   : > { %v1074_v3 = vcombine.low %v1050_v60, %v1066_v61  ;;  %v1075_v7 = vcombine.high %v1050_v60, %v1066_v61  ;;  %v1076_v11 = vcombine.low %v1057_v8, %v1073_v9  ;;  %v1077_v13 = vcombine.high %v1057_v8, %v1073_v9 }
 0x1c6   : > { %2921 = vmatmul.mubr.msk.f32.vlgmr.msra.gmra.mrb[2].mxu1 %vm1370_vm2, %v1074_v3 }
 0x1c7   : > { %2924 = vmatpush3.xpose.msk.msra.mxu1 %vm1370_vm2, %v1221_v4  ;;  %2925 = vmatprep.mubr.msk.f32.mxu1 %vm3359_vm0, %v3360_v1 }
 0x1c8   : > { %2928 = vmatprep.subr.mxu1 %v3360_v1 }
 0x1ca   : > { %2926 = vmatmul.mubr.msk.f32.vlgmr.msra.gmra.mrb[4].mxu1 %vm1370_vm2, %v1075_v7 }
 0x1cb   : > { %2929 = vmatpush3.xpose.msk.msra.mxu1 %vm1370_vm2, %v1222_v10  ;;  %2930 = vmatprep.mubr.msk.f32.mxu1 %vm3359_vm0, %v3360_v1 }
 0x1cc   : > { %2933 = vmatprep.subr.mxu1 %v3360_v1 }
 0x1ce   : > { %2931 = vmatmul.mubr.msk.f32.vlgmr.msra.gmra.mrb[6].mxu1 %vm1370_vm2, %v1076_v11 }
 0x1cf   : > { %2934 = vmatpush3.xpose.msk.msra.mxu1 %vm1370_vm2, %v1223_v12  ;;  %2935 = vmatprep.mubr.msk.f32.mxu1 %vm3359_vm0, %v3360_v1 }
 0x1d0   : > { %2943 = vmatprep.subr.mxu1 %v3360_v1 }
 0x1d2   : > { %2936 = vmatmul.mubr.msk.f32.vlgmr.msra.gmra.mrb[8].mxu1 %vm1370_vm2, %v1077_v13 }
 0x1d3   : > { %2945 = vmatprep.mubr.msk.f32.mxu1 %vm3359_vm0, %v3360_v1 }
 0x299   : > { %v1443_v16 = vpop.f32.mrb[2].mxu1 }
 0x29a   : > { %v2922_v17 = vpop.f32.mrb[3].mxu1  ;;  %v1676_v18 = vsel %vm1675_vm3, %v1443_v16, -inf }
 0x29b   : > { %1677 = vmax.xlane.f32.xlu0 %v1676_v18 }
 0x29d   : > { %v1519_v19 = vpop.f32.mrb[4].mxu1 }
 0x29e   : > { %v2927_v20 = vpop.f32.mrb[5].mxu1  ;;  %v1679_v21 = vsel %vm1675_vm3, %v1519_v19, -inf }
 0x29f   : > { %1680 = vmax.xlane.f32.xlu1 %v1679_v21 }
 0x2a1   : > { %v1595_v22 = vpop.f32.mrb[6].mxu1 }
 0x2a2   : > { %v2932_v23 = vpop.f32.mrb[7].mxu1  ;;  %v1682_v24 = vsel %vm1675_vm3, %v1595_v22, -inf }
 0x2a3   : > { %1683 = vmax.xlane.f32.xlu0 %v1682_v24 }
 0x2a5   : > { %v1671_v25 = vpop.f32.mrb[8].mxu1 }
 0x2a6   : > { %v2937_v27 = vpop.f32.mrb[9].mxu1  ;;  %v1685_v28 = vsel %vm1675_vm3, %v1671_v25, -inf }
 0x2a7   : > { %1686 = vmax.xlane.f32.xlu0 %v1685_v28 }
 0x2b0   : > { %1225 = vrot.lane.b32.xlu1 %v929_v30, %s3362_s21  ;;  %s4189_s21 = smov 96  }
 0x328   : > { %v1678_v31 = vpop.xlane.xlu0 %1677 }
 0x329   : > { %v1688_v32 = vsub.f32 %v1443_v16, %v1678_v31 }
 0x32b   : > { %v1692_v33 = vmul.f32 1.442695, %v1688_v32 }
 0x32c   : > { %v1681_v34 = vpop.xlane.xlu1 %1680 }
 0x32d   : > { %3231 = vpow2.f32 %v1692_v33  ;;  %v1689_v35 = vsub.f32 %v1519_v19, %v1681_v34 }
 0x32f   : > { %v1694_v36 = vmul.f32 1.442695, %v1689_v35 }
 0x330   : > { %v1684_v37 = vpop.xlane.xlu0 %1683  ;;  %v1226_v51 = vpop.permute.xlu1 %1225 }
 0x331   : > { %3233 = vpow2.f32 %v1694_v36  ;;  %v1690_v38 = vsub.f32 %v1595_v22, %v1684_v37 }
 0x333   : > { %v1696_v39 = vmul.f32 1.442695, %v1690_v38 }
 0x334   : > { %v1687_v40 = vpop.xlane.xlu0 %1686 }
 0x335   : > { %3235 = vpow2.f32 %v1696_v39  ;;  %v1691_v41 = vsub.f32 %v1671_v25, %v1687_v40 }
 0x337   : > { %v3785_v42 = vpop.eup %3231  ;;  %v1698_v43 = vmul.f32 1.442695, %v1691_v41 }
 0x338   : > { %v1700_v44 = vsel %vm1675_vm3, %v3785_v42, 0.0 }
 0x339   : > { %3237 = vpow2.f32 %v1698_v43  ;;  %1701 = vadd.xlane.f32.xlu1 %v1700_v44  ;;  %v2166_v44 = vld [vmem:[%s4190_s7 + $0x8] sm:$0xff] }
 0x33b   : > { %v3234_v45 = vpop.eup %3233 }
 0x33c   : > { %v1703_v46 = vsel %vm1675_vm3, %v3234_v45, 0.0 }
 0x33d   : > { %1704 = vadd.xlane.f32.xlu0 %v1703_v46 }
 0x33f   : > { %v3790_v47 = vpop.eup %3235 }
 0x340   : > { %v1706_v48 = vsel %vm1675_vm3, %v3790_v47, 0.0 }
 0x341   : > { %1707 = vadd.xlane.f32.xlu1 %v1706_v48 }
 0x343   : > { %v3794_v49 = vpop.eup %3237 }
 0x344   : > { %v1709_v50 = vsel %vm1675_vm3, %v3794_v49, 0.0 }
 0x345   : > { %1710 = vadd.xlane.f32.xlu0 %v1709_v50  ;;  %v2170_v50 = vld [vmem:[%s4190_s7 + $0x28] sm:$0xff] }
 0x352   : > { %1231 = vrot.lane.b32.xlu1 %v929_v30, %s3361_s30  ;;  %s4193_s30 = sld [smem:[#allocation23_spill]] }
 0x35b   : > { %1228 = vrot.lane.b32.xlu0 %v929_v30, %s4189_s21 }
 0x3c6   : > { %v1702_v52 = vpop.xlane.xlu1 %1701 }
 0x3c7   : > { %3239 = vrcp.f32 %v1702_v52 }
 0x3ca   : > { %v1705_v53 = vpop.xlane.xlu0 %1704 }
 0x3cb   : > { %3241 = vrcp.f32 %v1705_v53 }
 0x3ce   : > { %v1708_v54 = vpop.xlane.xlu1 %1707 }
 0x3cf   : > { %3243 = vrcp.f32 %v1708_v54 }
 0x3d1   : > { %v3240_v22 = vpop.eup %3239 }
 0x3d2   : > { %v1711_v55 = vpop.xlane.xlu0 %1710  ;;  %v1232_v56 = vpop.permute.xlu1 %1231  ;;  %v1716_v37 = vmul.f32 %v3240_v22, %v3785_v42  ;;  %v2165_v42 = vld [vmem:[%s4190_s7] sm:$0xff] }
 0x3d3   : > { %v1250_v58 = vcombine.low %v1226_v51, %v1232_v56  ;;  %v1251_v59 = vcombine.high %v1226_v51, %v1232_v56  ;;  %3245 = vrcp.f32 %v1711_v55  ;;  %v3103_v46 = vpack.c.bf16 %v2166_v44, %v2165_v42 }
 0x3d5   : > { %v1258_v63 = vrot.slane %v1250_v58, %v3719_v57  ;;  %v1265_v3 = vrot.slane %v1251_v59, %v3719_v57  ;;  %v3242_v28 = vpop.eup %3241 }
 0x3d6   : > { %v1229_v60 = vpop.permute.xlu0 %1228  ;;  %v1717_v38 = vmul.f32 %v3242_v28, %v3234_v45  ;;  %v2167_v45 = vld [vmem:[%s4190_s7 + $0x10] sm:$0xff] }
 0x3d7   : > { %v1234_v61 = vcombine.low %v929_v30, %v1229_v60  ;;  %v1235_v62 = vcombine.high %v929_v30, %v1229_v60 }
 0x3d9   : > { %v1242_v4 = vrot.slane %v1234_v61, %v3719_v57  ;;  %v1249_v5 = vrot.slane %v1235_v62, %v3719_v57  ;;  %v3244_v31 = vpop.eup %3243 }
 0x3da   : > { %v1718_v41 = vmul.f32 %v3244_v31, %v3790_v47  ;;  %v2168_v47 = vld [vmem:[%s4190_s7 + $0x18] sm:$0xff] }
 0x3db   : > { %v1266_v6 = vcombine.low %v1242_v4, %v1258_v63  ;;  %v1267_v7 = vcombine.high %v1242_v4, %v1258_v63  ;;  %v1282_v8 = vcombine.low %v1249_v5, %v1265_v3  ;;  %v1283_v9 = vcombine.high %v1249_v5, %v1265_v3 }
 0x3dc   : > { %v3106_v48 = vpack.c.bf16 %v2168_v47, %v2167_v45 }
 0x3dd   : > { %v1274_v10 = vrot.slane %v1266_v6, %v3721_v2  ;;  %v1281_v11 = vrot.slane %v1267_v7, %v3721_v2  ;;  %v1290_v12 = vrot.slane %v1282_v8, %v3721_v2  ;;  %v1297_v13 = vrot.slane %v1283_v9, %v3721_v2  ;;  %v3246_v36 = vpop.eup %3245 }
 0x3de   : > { %v1719_v43 = vmul.f32 %v3246_v36, %v3794_v49  ;;  %v2169_v49 = vld [vmem:[%s4190_s7 + $0x20] sm:$0xff] }
 0x3df   : > { %v1302_v14 = vcombine.low %v1274_v10, %v1281_v11  ;;  %v2733_v15 = vcombine.high %v1274_v10, %v1281_v11  ;;  %v1318_v16 = vcombine.low %v1290_v12, %v1297_v13  ;;  %v2734_v17 = vcombine.high %v1290_v12, %v1297_v13  ;;  %v2171_v12 = vld [vmem:[%s4190_s7 + $0x30] sm:$0xff]  ;;  %v2172_v13 = vld [vmem:[%s4190_s7 + $0x38] sm:$0xff]  ;;  %s4072_s7 = scalar_lea.hbm %s4195_s6, %s2763_s25 }
 0x3e0   : > { %v3109_v51 = vpack.c.bf16 %v2170_v50, %v2169_v49 }
 0x3e1   : > { %v1309_v18 = vrot.slane %v1302_v14, %v3719_v57  ;;  %v1317_v19 = vrot.slane %v2733_v15, %v3719_v57  ;;  %v1325_v20 = vrot.slane %v1318_v16, %v3719_v57  ;;  %v1333_v21 = vrot.slane %v2734_v17, %v3719_v57 }
 0x3e3   : > { %v1334_v23 = vcombine.low %v1309_v18, %v1317_v19  ;;  %v1350_v24 = vcombine.low %v1325_v20, %v1333_v21  ;;  %v1335_v25 = vcombine.high %v1309_v18, %v1317_v19  ;;  %v1351_v27 = vcombine.high %v1325_v20, %v1333_v21 }
 0x3e4   : > { %v3112_v18 = vpack.c.bf16 %v2172_v13, %v2171_v12  ;;  %v2382_v12 = vld [vmem:[%s4130_s13 + $0x20] sm:$0xff]  ;;  %v2383_v13 = vld [vmem:[%s4130_s13 + $0x28] sm:$0xff] }
 0x3e5   : > { %v1342_v29 = vrot.slane %v1334_v23, %v3721_v2  ;;  %v1358_v30 = vrot.slane %v1350_v24, %v3721_v2  ;;  %v1349_v32 = vrot.slane %v1335_v25, %v3721_v2  ;;  %v1365_v33 = vrot.slane %v1351_v27, %v3721_v2 }
 0x3e7   : > { %v1366_v34 = vcombine.low %v1342_v29, %v1358_v30  ;;  %v1367_v35 = vcombine.high %v1342_v29, %v1358_v30  ;;  %v1368_v39 = vcombine.low %v1349_v32, %v1365_v33  ;;  %v1369_v40 = vcombine.high %v1349_v32, %v1365_v33 }
 0x3e9   : > { %2939 = vmatpush3.msra.mxu0 %v1366_v34  ;;  %2944 = vmatpush3.msra.mxu1 %v1367_v35 }
 0x3ea   : > { %2941 = vmatmul.mubr.msk.f32.vlgmr.msra.gmra.mrb[4].mxu0 %vm1675_vm3, %v1716_v37  ;;  %2946 = vmatmul.mubr.msk.f32.vlgmr.msra.gmra.mrb[10].mxu1 %vm1675_vm3, %v1717_v38 }
 0x3eb   : > { %2948 = vmatprep.subr.mxu0 %v3360_v1  ;;  %2953 = vmatprep.subr.mxu1 %v3360_v1 }
 0x3ec   : > { %2949 = vmatpush3.msra.mxu0 %v1368_v39  ;;  %2954 = vmatpush3.msra.mxu1 %v1369_v40 }
 0x3ed   : > { %2950 = vmatprep.mubr.msk.f32.mxu0 %vm3359_vm0, %v3360_v1  ;;  %2955 = vmatprep.mubr.msk.f32.mxu1 %vm3359_vm0, %v3360_v1 }
 0x3ee   : > { %2951 = vmatmul.mubr.msk.f32.vlgmr.msra.gmra.mrb[6].mxu0 %vm1675_vm3, %v1718_v41  ;;  %2956 = vmatmul.mubr.msk.f32.vlgmr.msra.gmra.mrb[12].mxu1 %vm1675_vm3, %v1719_v43 }
 0x3ef   : > { %3102 = vmatprep.subr.bf16.mxu0 %v3358_v0  ;;  %2974 = vmatprep.mubr.msk.f32.mxu0 %vm3359_vm0, %v3360_v1 }
 0x3f0   : > { %3114 = vmatprep.subr.bf16.mxu1 %v3358_v0  ;;  %2993 = vmatprep.mubr.msk.f32.mxu1 %vm3359_vm0, %v3360_v1 }
 0x3f1   : > { %3104 = vmatpush3.bf16.msra.mxu0 %v3103_v46 }
 0x3f2   : > { %3105 = vmatprep.subr.bf16.mxu0 %v3358_v0 }
 0x3f5   : > { %3107 = vmatpush3.bf16.msra.mxu0 %v3106_v48 }
 0x3f6   : > { %3108 = vmatprep.subr.bf16.mxu0 %v3358_v0 }
 0x3f9   : > { %3110 = vmatpush3.bf16.msra.mxu0 %v3109_v51 }
 0x3fa   : > { %3111 = vmatprep.subr.bf16.mxu0 %v3358_v0 }
 0x3fd   : > { %3113 = vmatpush3.bf16.msra.mxu0 %v3112_v18 }
 0x3fe   : > { %3126 = vmatprep.subr.bf16.mxu0 %v3358_v0 }
 0x4bd   : > { %v1789_v52 = vpop.f32.mrb[4].mxu0  ;;  %v1862_v53 = vpop.f32.mrb[10].mxu1 }
 0x4be   : > { %v2942_v54 = vpop.f32.mrb[5].mxu0  ;;  %v2947_v55 = vpop.f32.mrb[11].mxu1 }
 0x4bf   : > { %v2284_v55 = vld [vmem:[%s4128_s11] sm:$0xff] }
 0x4c1   : > { %v1935_v56 = vpop.f32.mrb[6].mxu0  ;;  %v2008_v58 = vpop.f32.mrb[12].mxu1 }
 0x4c2   : > { %v2012_v59 = vcombine.low %v1789_v52, %v1935_v56  ;;  %v2013_v60 = vcombine.high %v1789_v52, %v1935_v56  ;;  %v2028_v61 = vcombine.low %v1862_v53, %v2008_v58  ;;  %v2029_v62 = vcombine.high %v1862_v53, %v2008_v58  ;;  %v2952_v63 = vpop.f32.mrb[7].mxu0  ;;  %v2957_v3 = vpop.f32.mrb[13].mxu1  ;;  %v2285_v56 = vld [vmem:[%s4128_s11 + $0x8] sm:$0xff] }
 0x4c3   : > { %v3115_v58 = vpack.c.bf16 %v2285_v56, %v2284_v55  ;;  %v2290_v3 = vld [vmem:[%s4128_s11 + $0x30] sm:$0xff]  ;;  %v2393_v56 = vld [vmem:[%s4130_s13 + $0x78] sm:$0xff] }
 0x4c4   : > { %v2020_v4 = vrot.slane %v2012_v59, %v3719_v57  ;;  %v2027_v5 = vrot.slane %v2013_v60, %v3719_v57  ;;  %v2036_v6 = vrot.slane %v2028_v61, %v3719_v57  ;;  %v2043_v7 = vrot.slane %v2029_v62, %v3719_v57  ;;  %v2287_v59 = vld [vmem:[%s4128_s11 + $0x18] sm:$0xff]  ;;  %v2288_v61 = vld [vmem:[%s4128_s11 + $0x20] sm:$0xff]  ;;  %v2289_v62 = vld [vmem:[%s4128_s11 + $0x28] sm:$0xff] }
 0x4c5   : > { %3116 = vmatpush3.bf16.msra.mxu1 %v3115_v58  ;;  %v3121_v63 = vpack.c.bf16 %v2289_v62, %v2288_v61  ;;  %v2392_v55 = vld [vmem:[%s4130_s13 + $0x70] sm:$0xff]  ;;  %v2753_v61 = vld [vmem:[%s4129_s12] ss:$0 sm:$0xff] }
 0x4c6   : > { %v2044_v8 = vcombine.low %v2020_v4, %v2036_v6  ;;  %v2045_v9 = vcombine.high %v2020_v4, %v2036_v6  ;;  %v2060_v10 = vcombine.low %v2027_v5, %v2043_v7  ;;  %v2061_v11 = vcombine.high %v2027_v5, %v2043_v7  ;;  %3117 = vmatprep.subr.bf16.mxu1 %v3358_v0  ;;  %v2291_v4 = vld [vmem:[%s4128_s11 + $0x38] sm:$0xff]  ;;  %v2378_v6 = vld [vmem:[%s4130_s13] sm:$0xff]  ;;  %v2379_v7 = vld [vmem:[%s4130_s13 + $0x8] sm:$0xff] }
 0x4c7   : > { %v3124_v5 = vpack.c.bf16 %v2291_v4, %v2290_v3  ;;  %v2485_v58 = vld [vmem:[%s4132_s15 + $0x70] sm:$0xff] }
 0x4c8   : > { %v2052_v14 = vrot.slane %v2044_v8, %v3721_v2  ;;  %v2059_v15 = vrot.slane %v2045_v9, %v3721_v2  ;;  %v2068_v16 = vrot.slane %v2060_v10, %v3721_v2  ;;  %v2075_v17 = vrot.slane %v2061_v11, %v3721_v2  ;;  %v2380_v9 = vld [vmem:[%s4130_s13 + $0x10] sm:$0xff]  ;;  %v2381_v10 = vld [vmem:[%s4130_s13 + $0x18] sm:$0xff] }
 0x4c9   : > { %v3127_v8 = vpack.c.bf16 %v2379_v7, %v2378_v6  ;;  %v3130_v11 = vpack.c.bf16 %v2381_v10, %v2380_v9 }
 0x4ca   : > { %v2080_v19 = vcombine.low %v2052_v14, %v2059_v15  ;;  %v2747_v20 = vcombine.high %v2052_v14, %v2059_v15  ;;  %v2096_v21 = vcombine.low %v2068_v16, %v2075_v17  ;;  %v2748_v22 = vcombine.high %v2068_v16, %v2075_v17 }
 0x4cb   : > { %v3133_v14 = vpack.c.bf16 %v2383_v13, %v2382_v12 }
 0x4cc   : > { %v2087_v23 = vrot.slane %v2080_v19, %v3719_v57  ;;  %v2095_v24 = vrot.slane %v2747_v20, %v3719_v57  ;;  %v2103_v25 = vrot.slane %v2096_v21, %v3719_v57  ;;  %v2111_v27 = vrot.slane %v2748_v22, %v3719_v57  ;;  %v2751_v19 = vld [vmem:[%s4126_s9] ss:$0 sm:$0xff]  ;;  %v2472_v22 = vld [vmem:[%s4132_s15 + $0x8] sm:$0xff] }
 0x4cd   : > { %v2471_v21 = vld [vmem:[%s4132_s15] sm:$0xff] }
 0x4ce   : > { %v2113_v28 = vcombine.high %v2087_v23, %v2095_v24  ;;  %v2129_v29 = vcombine.high %v2103_v25, %v2111_v27  ;;  %v2112_v30 = vcombine.low %v2087_v23, %v2095_v24  ;;  %v2128_v31 = vcombine.low %v2103_v25, %v2111_v27  ;;  %v2752_v23 = vld [vmem:[%s4127_s10] ss:$0 sm:$0xff] }
 0x4cf   : > { %v3151_v25 = vpack.c.bf16 %v2472_v22, %v2471_v21 }
 0x4d0   : > { %v2127_v32 = vrot.slane %v2113_v28, %v3721_v2  ;;  %v2143_v33 = vrot.slane %v2129_v29, %v3721_v2  ;;  %v2120_v34 = vrot.slane %v2112_v30, %v3721_v2  ;;  %v2136_v35 = vrot.slane %v2128_v31, %v3721_v2  ;;  %v2749_v2 = vld [vmem:[%s4125_s8] ss:$0 sm:$0xff]  ;;  %v2473_v28 = vld [vmem:[%s4132_s15 + $0x10] sm:$0xff]  ;;  %v2474_v29 = vld [vmem:[%s4132_s15 + $0x18] sm:$0xff] }
 0x4d1   : > { %v3154_v30 = vpack.c.bf16 %v2474_v29, %v2473_v28  ;;  %v2475_v31 = vld [vmem:[%s4132_s15 + $0x20] sm:$0xff] }
 0x4d2   : > { %v2146_v36 = vcombine.low %v2127_v32, %v2143_v33  ;;  %v2145_v37 = vcombine.high %v2120_v34, %v2136_v35  ;;  %v2147_v38 = vcombine.high %v2127_v32, %v2143_v33  ;;  %v2144_v39 = vcombine.low %v2120_v34, %v2136_v35  ;;  %v2476_v32 = vld [vmem:[%s4132_s15 + $0x28] sm:$0xff]  ;;  %v2385_v34 = vld [vmem:[%s4130_s13 + $0x38] sm:$0xff]  ;;  %v2477_v35 = vld [vmem:[%s4132_s15 + $0x30] sm:$0xff] }
 0x4d3   : > { %v3157_v33 = vpack.c.bf16 %v2476_v32, %v2475_v31 }
 0x4d4   : > { %2153 = vrot.lane.b32.xlu0 %v2146_v36, %s3366_s19  ;;  %2149 = vrot.lane.b32.xlu1 %v2145_v37, %s3367_s20  ;;  %v2478_v37 = vld [vmem:[%s4132_s15 + $0x38] sm:$0xff]  ;;  %s4191_s19 = sld [smem:[#allocation13_spill]]  ;;  %s2632_s20 = scalar_lea.sflag [#allocation4], %s3585_s2 }
 0x4d8   : > { %2157 = vrot.lane.b32.xlu1 %v2147_v38, %s3368_s24  ;;  %v3160_v38 = vpack.c.bf16 %v2478_v37, %v2477_v35  ;;  %s3289_s24 = scalar_lea.vmem %s4074_s28, 128 }
 0x4d9   : > { %p3290_p6 = scmp.ne.s32.totalorder %s4074_s28, %s3289_s24 }
 0x4da   : > { %p4196_p11 = scmp.ne.s32.totalorder %s4191_s19, 0 }
 0x4dc   : > { %p3291_p12 = pnand %p3290_p6, %p4196_p11 }
 0x4de   : > { %p3292_p13 = pneg %p3291_p12 }
 0x546   : > { %v2150_v57 = vpop.permute.xlu1 %2149  ;;  %v2154_v40 = vpop.permute.xlu0 %2153 }
 0x547   : > { %v2160_v41 = vsel %vm1370_vm2, %v2144_v39, %v2150_v57  ;;  %v2386_v39 = vld [vmem:[%s4130_s13 + $0x40] sm:$0xff]  ;;  %v2387_v57 = vld [vmem:[%s4130_s13 + $0x48] sm:$0xff] }
 0x548   : > { %v2162_v42 = vsel %vm2161_vm4, %v2160_v41, %v2154_v40  ;;  %v2479_v40 = vld [vmem:[%s4132_s15 + $0x40] sm:$0xff]  ;;  %v3139_v41 = vpack.c.bf16 %v2387_v57, %v2386_v39 }
 0x54a   : > { %v2158_v43 = vpop.permute.xlu1 %2157 }
 0x54b   : > { %v2164_v44 = vsel %vm2163_vm5, %v2162_v42, %v2158_v43  ;;  %v2480_v43 = vld [vmem:[%s4132_s15 + $0x48] sm:$0xff] }
 0x54c   : > { %2975 = vmatmul.mubr.msk.f32.vlgmr.msra.gmra.mrb[8].mxu0 %vm688_vm1, %v2164_v44  ;;  %v3163_v42 = vpack.c.bf16 %v2480_v43, %v2479_v40  ;;  %v2388_v44 = vld [vmem:[%s4130_s13 + $0x50] sm:$0xff] }
 0x54d   : > { %3028 = vmatprep.mubr.msk.f32.mxu0 %vm3359_vm0, %v3360_v1  ;;  %3128 = vmatpush3.bf16.msra.mxu0 %v3127_v8 }
 0x54e   : > { %3129 = vmatprep.subr.bf16.mxu0 %v3358_v0 }
 0x551   : > { %3131 = vmatpush3.bf16.msra.mxu0 %v3130_v11 }
 0x552   : > { %3132 = vmatprep.subr.bf16.mxu0 %v3358_v0 }
 0x555   : > { %3134 = vmatpush3.bf16.msra.mxu0 %v3133_v14 }
 0x556   : > { %3135 = vmatprep.subr.bf16.mxu0 %v3358_v0 }
 0x61f   : > { %v2249_v45 = vpop.f32.mrb[8].mxu0 }
 0x620   : > { %v2250_v46 = vadd.f32 %v2749_v2, %v2249_v45  ;;  %v2976_v47 = vpop.f32.mrb[9].mxu0  ;;  %v2389_v2 = vld [vmem:[%s4130_s13 + $0x58] sm:$0xff]  ;;  %v2481_v45 = vld [vmem:[%s4132_s15 + $0x50] sm:$0xff] }
 0x621   : > { %v2482_v47 = vld [vmem:[%s4132_s15 + $0x58] sm:$0xff] }
 0x622   : > { %v2253_v48 = vadd.f32 %v2250_v46, %v3658_v26  ;;  %v2286_v26 = vld [vmem:[%s4128_s11 + $0x10] sm:$0xff]  ;;  %v3142_v46 = vpack.c.bf16 %v2389_v2, %v2388_v44 }
 0x623   : > { %v3118_v60 = vpack.c.bf16 %v2287_v59, %v2286_v26  ;;  %v2486_v26 = vld [vmem:[%s4132_s15 + $0x78] sm:$0xff]  ;;  %v3148_v59 = vpack.c.bf16 %v2393_v56, %v2392_v55 }
 0x624   : > { %v2256_v49 = vsel %vm688_vm1, %v2253_v48, 0.0 }
 0x625   : > { %2257 = vadd.xlane.f32.xlu0 %v2256_v49  ;;  %3119 = vmatpush3.bf16.msra.mxu1 %v3118_v60  ;;  %v2391_v49 = vld [vmem:[%s4130_s13 + $0x68] sm:$0xff]  ;;  %v3172_v60 = vpack.c.bf16 %v2486_v26, %v2485_v58 }
 0x626   : > { %3120 = vmatprep.subr.bf16.mxu1 %v3358_v0 }
 0x629   : > { %3122 = vmatpush3.bf16.msra.mxu1 %v3121_v63 }
 0x62a   : > { %3123 = vmatprep.subr.bf16.mxu1 %v3358_v0 }
 0x62d   : > { %3125 = vmatpush3.bf16.msra.mxu1 %v3124_v5 }
 0x62e   : > { %3150 = vmatprep.subr.bf16.mxu1 %v3358_v0 }
 0x6b2   : > { %v2258_v50 = vpop.xlane.xlu0 %2257 }
 0x6b3   : > { %v2260_v51 = vmul.f32 0.015625, %v2258_v50  ;;  %v3166_v50 = vpack.c.bf16 %v2482_v47, %v2481_v45 }
 0x6b5   : > { %v2261_v52 = vsub.f32 %v2253_v48, %v2260_v51  ;;  %v2390_v48 = vld [vmem:[%s4130_s13 + $0x60] sm:$0xff] }
 0x6b6   : > { %v2483_v51 = vld [vmem:[%s4132_s15 + $0x60] sm:$0xff] }
 0x6b7   : > { %v2262_v53 = vmul.f32 %v2261_v52, %v2261_v52 }
 0x6b9   : > { %v2263_v54 = vsel %vm688_vm1, %v2262_v53, 0.0  ;;  %v3145_v53 = vpack.c.bf16 %v2391_v49, %v2390_v48  ;;  %v2761_v49 = vld [vmem:[%s4193_s30] ss:$0 sm:$0xff] }
 0x6ba   : > { %2264 = vadd.xlane.f32.xlu1 %v2263_v54 }
 0x747   : > { %v2265_v15 = vpop.xlane.xlu1 %2264 }
 0x748   : > { %v2266_v16 = vmul.f32 0.015625, %v2265_v15 }
 0x74a   : > { %v2267_v17 = vadd.f32 1e-05, %v2266_v16 }
 0x74c   : > { %3247 = vrsqrt.f32 %v2267_v17 }
 0x756   : > { %v3248_v18 = vpop.eup %3247 }
 0x757   : > { %v2269_v20 = vmul.f32 %v3248_v18, %v2261_v52  ;;  %v2484_v52 = vld [vmem:[%s4132_s15 + $0x68] sm:$0xff]  ;;  %v2756_v18 = vld [vmem:[%s4131_s14] ss:$0 sm:$0xff] }
 0x758   : > { %v3169_v54 = vpack.c.bf16 %v2484_v52, %v2483_v51 }
 0x759   : > { %v2276_v24 = vmul.f32 %v2751_v19, %v2269_v20 }
 0x75b   : > { %v3950_v27 = vadd.f32 %v2752_v23, %v2276_v24 }
 0x75d   : > { %2994 = vmatmul.mubr.msk.f32.vlgmr.msra.gmra.mrb[14].mxu1 %vm688_vm1, %v3950_v27 }
 0x75e   : > { %3152 = vmatpush3.bf16.msra.mxu1 %v3151_v25  ;;  %3063 = vmatprep.mubr.msk.f32.mxu1 %vm3359_vm0, %v3360_v1  ;;  %v2384_v1 = vld [vmem:[%s4130_s13 + $0x30] sm:$0xff] }
 0x75f   : > { %3153 = vmatprep.subr.bf16.mxu1 %v3358_v0  ;;  %v3136_v36 = vpack.c.bf16 %v2385_v34, %v2384_v1  ;;  %v2758_v34 = vld [vmem:[%s4134_s17] ss:$0 sm:$0xff] }
 0x761   : > { %3137 = vmatpush3.bf16.msra.mxu0 %v3136_v36  ;;  %v2759_v36 = vld [vmem:[%s4135_s18] ss:$0 sm:$0xff] }
 0x762   : > { %3155 = vmatpush3.bf16.msra.mxu1 %v3154_v30  ;;  %3138 = vmatprep.subr.bf16.mxu0 %v3358_v0 }
 0x763   : > { %3156 = vmatprep.subr.bf16.mxu1 %v3358_v0 }
 0x765   : > { %3140 = vmatpush3.bf16.msra.mxu0 %v3139_v41 }
 0x766   : > { %3158 = vmatpush3.bf16.msra.mxu1 %v3157_v33  ;;  %3141 = vmatprep.subr.bf16.mxu0 %v3358_v0 }
 0x767   : > { %3159 = vmatprep.subr.bf16.mxu1 %v3358_v0 }
 0x769   : > { %3143 = vmatpush3.bf16.msra.mxu0 %v3142_v46 }
 0x76a   : > { %3161 = vmatpush3.bf16.msra.mxu1 %v3160_v38  ;;  %3144 = vmatprep.subr.bf16.mxu0 %v3358_v0 }
 0x76b   : > { %3162 = vmatprep.subr.bf16.mxu1 %v3358_v0 }
 0x76d   : > { %3146 = vmatpush3.bf16.msra.mxu0 %v3145_v53 }
 0x76e   : > { %3164 = vmatpush3.bf16.msra.mxu1 %v3163_v42  ;;  %3147 = vmatprep.subr.bf16.mxu0 %v3358_v0 }
 0x76f   : > { %3165 = vmatprep.subr.bf16.mxu1 %v3358_v0 }
 0x771   : > { %3149 = vmatpush3.bf16.msra.mxu0 %v3148_v59 }
 0x772   : > { %3167 = vmatpush3.bf16.msra.mxu1 %v3166_v50 }
 0x773   : > { %3168 = vmatprep.subr.bf16.mxu1 %v3358_v0 }
 0x776   : > { %3170 = vmatpush3.bf16.msra.mxu1 %v3169_v54 }
 0x777   : > { %3171 = vmatprep.subr.bf16.mxu1 %v3358_v0  ;;  %v2757_v0 = vld [vmem:[%s4133_s16] ss:$0 sm:$0xff] }
 0x77a   : > { %3173 = vmatpush3.bf16.msra.mxu1 %v3172_v60 }
 0x830   : > { %v2368_v62 = vpop.f32.mrb[14].mxu1 }
 0x831   : > { %v2369_v63 = vadd.f32 %v2753_v61, %v2368_v62  ;;  %v2995_v3 = vpop.f32.mrb[15].mxu1 }
 0x833   : > { %v2373_v4 = vmin.f32 %v2369_v63, 0.0  ;;  %vm2372_vm6 = vcmp.gt.f32.partialorder %v2369_v63, 0.0 }
 0x835   : > { %v2374_v5 = vmul.f32 1.442695, %v2373_v4 }
 0x837   : > { %3249 = vpow2.f32 %v2374_v5 }
 0x841   : > { %v3250_v6 = vpop.eup %3249 }
 0x842   : > { %v2755_v7 = vadd.f32 -1.0, %v3250_v6 }
 0x844   : > { %v2377_v8 = vsel %vm2372_vm6, %v2369_v63, %v2755_v7 }
 0x845   : > { %3029 = vmatmul.mubr.f32.vlgmr.msra.gmra.mrb[10].mxu0 %v2377_v8  ;;  %3064 = vmatmul.mubr.f32.vlgmr.msra.gmra.mrb[16].mxu1 %v2377_v8 }
 0x918   : > { %v2467_v9 = vpop.f32.mrb[10].mxu0  ;;  %v2560_v10 = vpop.f32.mrb[16].mxu1 }
 0x919   : > { %v2561_v11 = vadd.f32 %v2757_v0, %v2560_v10  ;;  %v3030_v12 = vpop.f32.mrb[11].mxu0  ;;  %v3065_v13 = vpop.f32.mrb[17].mxu1  ;;  %v2468_v19 = vadd.f32 %v2756_v18, %v2467_v9 }
 0x91b   : > { %v2564_v14 = vsub.f32 0.0, %v2561_v11 }
 0x91d   : > { %v2565_v15 = vmul.f32 1.442695, %v2564_v14 }
 0x91f   : > { %3251 = vpow2.f32 %v2565_v15 }
 0x929   : > { %v3252_v16 = vpop.eup %3251 }
 0x92a   : > { %v2567_v17 = vadd.f32 1.0, %v3252_v16 }
 0x92c   : > { %3253 = vrcp.f32 %v2567_v17 }
 0x936   : > { %v3254_v20 = vpop.eup %3253 }
 0x937   : > { %v2569_v21 = vmul.f32 %v3254_v20, %v2468_v19 }
 0x939   : > { %v2570_v22 = vadd.f32 %v2569_v21, %v3950_v27 }
 0x93b   : > { %v2573_v23 = vsel %vm688_vm1, %v2570_v22, 0.0 }
 0x93c   : > { %2574 = vadd.xlane.f32.xlu0 %v2573_v23 }
 0x9c9   : > { %v2575_v24 = vpop.xlane.xlu0 %2574 }
 0x9ca   : > { %v2576_v25 = vmul.f32 0.015625, %v2575_v24 }
 0x9cc   : > { %v2577_v28 = vsub.f32 %v2570_v22, %v2576_v25 }
 0x9ce   : > { %v2578_v29 = vmul.f32 %v2577_v28, %v2577_v28 }
 0x9d0   : > { %v2579_v30 = vsel %vm688_vm1, %v2578_v29, 0.0 }
 0x9d1   : > { %2580 = vadd.xlane.f32.xlu0 %v2579_v30 }
 0xa5e   : > { %v2581_v31 = vpop.xlane.xlu0 %2580 }
 0xa5f   : > { %v2582_v32 = vmul.f32 0.015625, %v2581_v31 }
 0xa61   : > { %v2583_v33 = vadd.f32 1e-05, %v2582_v32 }
 0xa63   : > { %3255 = vrsqrt.f32 %v2583_v33 }
 0xa6d   : > { %v3256_v1 = vpop.eup %3255 }
 0xa6e   : > { %v2585_v35 = vmul.f32 %v3256_v1, %v2577_v28 }
 0xa70   : > { %v2592_v37 = vmul.f32 %v2758_v34, %v2585_v35 }
 0xa72   : > { %v2599_v38 = vadd.f32 %v2759_v36, %v2592_v37 }
 0xa74   : > { %v2600_v39 = vadd.f32 %v2599_v38, %v3950_v27  ;;  %v2760_v27 = vld [vmem:[%s4192_s26] ss:$0 sm:$0xff]  ;;  %s3293_s26 = sshll.u32 %s3369_s3, 4  ;;  %s3294_s26 = int_to_ptr.vmem [resolvable:$false] %s3293_s26 }
 0xa75   : > { %s3295_s22 = scalar_lea.vmem %s3294_s26, 256  ;;  %p3296_p7 = scmp.lt.s32.totalorder %s4074_s28, %s3294_s26 }
 0xa76   : > { %v2603_v57 = vsel %vm688_vm1, %v2600_v39, 0.0  ;;  %p3297_p10 = scmp.lt.s32.totalorder %s3295_s22, %s3289_s24 }
 0xa77   : > { %2604 = vadd.xlane.f32.xlu1 %v2603_v57 }
 0xa78   : > { %p3298_p2 = por %p3297_p10, %p3296_p7 }
 0xa7a   : > { %p3299_p4 = pnand %p3298_p2, %p3292_p13 }
 0xb04   : > { %v2605_v40 = vpop.xlane.xlu1 %2604 }
 0xb05   : > { %v2606_v41 = vmul.f32 0.015625, %v2605_v40 }
 0xb07   : > { %v2607_v43 = vsub.f32 %v2600_v39, %v2606_v41 }
 0xb09   : > { %v2608_v42 = vmul.f32 %v2607_v43, %v2607_v43 }
 0xb0b   : > { %v2609_v44 = vsel %vm688_vm1, %v2608_v42, 0.0 }
 0xb0c   : > { %2610 = vadd.xlane.f32.xlu0 %v2609_v44 }
 0xb99   : > { %v2611_v2 = vpop.xlane.xlu0 %2610 }
 0xb9a   : > { %v2612_v45 = vmul.f32 0.015625, %v2611_v2 }
 0xb9c   : > { %v2613_v46 = vadd.f32 1e-05, %v2612_v45 }
 0xb9e   : > { %3257 = vrsqrt.f32 %v2613_v46 }
 0xba8   : > { %v3258_v47 = vpop.eup %3257 }
 0xba9   : > { %v2615_v48 = vmul.f32 %v3258_v47, %v2607_v43 }
 0xbab   : > { %v2622_v50 = vmul.f32 %v2760_v27, %v2615_v48 }
 0xbad   : > { %v2629_v51 = vadd.f32 %v2761_v49, %v2622_v50 }
 0xbaf   : > { %2630 = vst.msk [vmem:[%s671_s23] sm:$0xff] %vm688_vm1, %v2629_v51 }
 0xbb0   : > { %3302 = shalt.err (!%p3299_p4)
}
 0xbb1   : > { %s3303_s2 = scalar_lea.hbm %s4072_s7, 128  ;;  %s3307_s21 = scalar_lea.hbm %s4195_s6, 256 }
 0xbb2   : > { %p3304_p5 = scmp.ne.s32.totalorder %s4072_s7, %s3303_s2  ;;  %p3308_p0 = scmp.lt.u32.totalorder %s4072_s7, %s4195_s6 }
 0xbb3   : > { %p3309_p1 = scmp.lt.u32.totalorder %s3307_s21, %s3303_s2  ;;  %p3311_p6 = scmp.lt.u32.totalorder %s3303_s2, %s4072_s7 }
 0xbb4   : > { %p3305_p8 = pnand %p3304_p5, %p4196_p11 }
 0xbb5   : > { %p3310_p3 = por %p3309_p1, %p3308_p0 }
 0xbb6   : > { %p3306_p9 = pneg %p3305_p8 }
 0xbb7   : > { %p3312_p12 = por %p3311_p6, %p3310_p3 }
 0xbb9   : > { %p3313_p13 = pnand %p3312_p12, %p3306_p9 }
 0xbbb   : > { %3316 = shalt.err (!%p3313_p13)
}
 0xbbc   : > { %3176 = dma.vmem_to_hbm [thread:$0]  (%p4196_p11), %s4074_s28, 128, %s4072_s7, %s2632_s20  }
 0xbbd PF: > { %s4197_s0 = sld [smem:[#allocation8_spill]]  ;;  %p4198_p7 = scmp.ne.s32.totalorder %s4177_s1, 0 }
 0xbbe   : > { %p4199_p10 = scmp.ge.s32.totalorder %s3355_s27, 2 }
 0xbc0   : > { %p3183_p2 = pnand %p4199_p10, %p4198_p7 }
 0xbc3   : > { %s2657_s23 = sand.u32 1, %s4197_s0  }
 0xbc4   : > { %s2658_s24 = scalar_lea.sflag [#allocation4], %s2657_s23 }
 0xbc5   : > { %3338 = dma.done.wait (!%p3183_p2), %s2658_s24, 128  }
 0xbc6   : > { %3340 = vsyncadd (!%p3183_p2), %s2658_s24, 4294967168  ;;  %s4200_s27 = sld [smem:[#allocation11_spill]]  ;;  %s4201_s2 = sld [smem:[#allocation9_spill]] }
 0xbc7   : > { %s4202_s25 = sld [smem:[#allocation10_spill]]  ;;  %s4203_s26 = sld [smem:[#allocation12_spill]] }
 0xbcc   : > { %p34_p4 = scmp.ge.s32.totalorder %s4200_s27, 4  }
 0xbce   :  { %36 = sbr.rel (!%p34_p4) target bundleno = 17 (0x11), region = 149 }
 0xbd5   :  { %2663 = vsyncpa [#allocation3], 1 }
 0xbd6   :  { %2665 = vsyncpa [#allocation3 + $0x1], 1 }
 0xbd7   :  { %2666 = vsyncpa [#allocation4], 1 }
 0xbd8   :  { %2668 = vsyncpa [#allocation4 + $0x1], 1 }

</bundles_post_ra>
